<compile_context>
chip_gen: v5e
topology: v5e:2x2
jax: 0.10.0
libtpu: 0.0.40
codegen_flags: <defaults>
</compile_context>

<pallas_src>
import jax
import jax.numpy as jnp
from jax.experimental import pallas as pl
from jax.experimental.pallas import tpu as pltpu

_EPS = 1e-5


def _round_up(a, b):
    return ((a + b - 1) // b) * b


# ----------------------------------------------------------------------------
# Kernels
# ----------------------------------------------------------------------------
def _biasfree_ln_kernel_cl(x_ref, w_ref, o_ref):
    """Channels-last tile: x_ref (tm, C), w_ref (1, C)."""
    x = x_ref[...].astype(jnp.float32)
    c = x.shape[-1]
    inv_c = 1.0 / float(c)
    # Two independent lane (XLU) reductions — no serialization through the mean.
    s1 = jnp.sum(x, axis=-1, keepdims=True)
    s2 = jnp.sum(x * x, axis=-1, keepdims=True)
    mu = s1 * inv_c
    var = jnp.maximum(s2 * inv_c - mu * mu, 0.0)           # unbiased=False
    inv = jax.lax.rsqrt(var + _EPS)                        # EUP
    w = w_ref[...].astype(jnp.float32)
    # Bias-free: mean is NOT subtracted in the output (matches the PyTorch ref).
    o_ref[...] = (x * inv * w).astype(o_ref.dtype)


def _biasfree_ln_kernel_cf(x_ref, w_ref, o_ref):
    """Channels-first tile: x_ref (1, C, tn); C on sublanes, tn on lanes."""
    x = x_ref[...].astype(jnp.float32)
    c = x.shape[1]
    inv_c = 1.0 / float(c)
    # Sublane reduction over C: cheap VPU adds across stacked vregs (no XLU).
    s1 = jnp.sum(x, axis=1, keepdims=True)                 # (1, 1, tn)
    s2 = jnp.sum(x * x, axis=1, keepdims=True)
    mu = s1 * inv_c
    var = jnp.maximum(s2 * inv_c - mu * mu, 0.0)
    inv = jax.lax.rsqrt(var + _EPS)
    w = w_ref[...].astype(jnp.float32)                     # (1, C, 1)
    # Lane-dense store: last dim tn is a multiple of 128.
    o_ref[...] = (x * inv * w).astype(o_ref.dtype)


def _vmem_limit_bytes(block_bytes, f32_bytes):
    # Double-buffered in+out blocks + f32 temporaries + headroom, clamped to the
    # scoped-VMEM ceilings that are safe on every generation (v5e/v6e/v7x).
    return int(min(max(4 * block_bytes + 4 * f32_bytes + (2 << 20), 16 << 20), 32 << 20))


# ----------------------------------------------------------------------------
# Wrappers
# ----------------------------------------------------------------------------
def biasfree_layernorm(x, weight, *, tm=None, target_block_bytes=1 << 20):
    """x: (..., C); weight: (C,). Normalizes over the last axis."""
    orig_shape = x.shape
    C = orig_shape[-1]
    x2 = x.reshape(-1, C)
    N = x2.shape[0]
    itemsize = jnp.dtype(x.dtype).itemsize

    # Row tile: ~target_block_bytes of input per grid step, capped to the data.
    if tm is None:
        tm = target_block_bytes // max(C * itemsize, 1)
    tm = max(8, min(int(tm), 8192, _round_up(N, 8)))
    tm = _round_up(tm, 8)

    # Ragged token counts: pad with zero rows (they normalize to 0, then dropped).
    N_pad = _round_up(N, tm)
    if N_pad != N:
        x2 = jnp.pad(x2, ((0, N_pad - N), (0, 0)))

    w2 = weight.reshape(1, C)

    block_bytes = tm * C * itemsize
    f32_bytes = tm * C * 4
    cost = pl.CostEstimate(
        flops=7 * N_pad * C,
        transcendentals=N_pad,
        bytes_accessed=2 * N_pad * C * itemsize + C * itemsize,
    )

    out = pl.pallas_call(
        _biasfree_ln_kernel_cl,
        out_shape=jax.ShapeDtypeStruct((N_pad, C), x.dtype),
        grid=(N_pad // tm,),
        in_specs=[
            pl.BlockSpec((tm, C), lambda i: (i, 0)),
            # Constant index_map: weight stays VMEM-resident across the grid.
            pl.BlockSpec((1, C), lambda i: (0, 0)),
        ],
        out_specs=pl.BlockSpec((tm, C), lambda i: (i, 0)),
        compiler_params=pltpu.CompilerParams(
            dimension_semantics=("parallel",),
            vmem_limit_bytes=_vmem_limit_bytes(block_bytes, f32_bytes),
        ),
        cost_estimate=cost,
    )(x2, w2)

    if N_pad != N:
        out = out[:N]
    return out.reshape(orig_shape)


def biasfree_layernorm_nchw(x, weight, *, tn=None, target_block_bytes=1 << 20):
    """x: (B, C, H, W); weight: (C,). Normalizes over the channel axis.

    Lane-dense path for small C: no NCHW->NHWC transpose, channels reduced on
    sublanes, spatial positions packed onto lanes.
    """
    B, C, H, W = x.shape
    S = H * W
    x3 = x.reshape(B, C, S)
    itemsize = jnp.dtype(x.dtype).itemsize

    if tn is None:
        tn = target_block_bytes // max(C * itemsize, 1)
    tn = max(128, min(int(tn), 16384, _round_up(S, 128)))
    tn = _round_up(tn, 128)

    S_pad = _round_up(S, tn)
    if S_pad != S:
        x3 = jnp.pad(x3, ((0, 0), (0, 0), (0, S_pad - S)))

    w3 = weight.reshape(1, C, 1)

    block_bytes = C * tn * itemsize
    f32_bytes = C * tn * 4
    cost = pl.CostEstimate(
        flops=7 * B * S_pad * C,
        transcendentals=B * S_pad,
        bytes_accessed=2 * B * S_pad * C * itemsize + C * itemsize,
    )

    out = pl.pallas_call(
        _biasfree_ln_kernel_cf,
        out_shape=jax.ShapeDtypeStruct((B, C, S_pad), x.dtype),
        grid=(B, S_pad // tn),
        in_specs=[
            pl.BlockSpec((1, C, tn), lambda b, i: (b, 0, i)),
            pl.BlockSpec((1, C, 1), lambda b, i: (0, 0, 0)),
        ],
        out_specs=pl.BlockSpec((1, C, tn), lambda b, i: (b, 0, i)),
        compiler_params=pltpu.CompilerParams(
            dimension_semantics=("parallel", "parallel"),
            vmem_limit_bytes=_vmem_limit_bytes(block_bytes, f32_bytes),
        ),
        cost_estimate=cost,
    )(x3, w3)

    if S_pad != S:
        out = out[:, :, :S]
    return out.reshape(B, C, H, W)


# ----------------------------------------------------------------------------
# Pure-JAX references
# ----------------------------------------------------------------------------
def biasfree_layernorm_ref(x, weight):
    xf = x.astype(jnp.float32)
    var = jnp.var(xf, axis=-1, keepdims=True)
    return (xf / jnp.sqrt(var + _EPS) * weight.astype(jnp.float32)).astype(x.dtype)


def biasfree_layernorm_nchw_ref(x, weight):
    xf = x.astype(jnp.float32)
    var = jnp.var(xf, axis=1, keepdims=True)
    w = weight.astype(jnp.float32).reshape(1, -1, 1, 1)
    return (xf / jnp.sqrt(var + _EPS) * w).astype(x.dtype)


if __name__ == "__main__":
    key = jax.random.PRNGKey(0)
    k1, k2, k3, k4 = jax.random.split(key, 4)

    # 1) Channels-last path (exact PyTorch module semantics): (B, H*W, C).
    B, HW, C = 2, 256, 32
    x = jax.random.normal(k1, (B, HW, C), dtype=jnp.float32)
    weight = jnp.ones((C,), dtype=jnp.float32)  # nn.Parameter(torch.ones(C))
    out = jax.block_until_ready(biasfree_layernorm(x, weight))
    ref = biasfree_layernorm_ref(x, weight)
    assert out.shape == x.shape and out.dtype == x.dtype
    assert jnp.allclose(out, ref, atol=1e-5, rtol=1e-4), "channels-last mismatch"

    # 2) Channels-first (NCHW) lane-dense path: (B, C, H, W).
    Bc, Cc, Hc, Wc = 2, 32, 16, 16
    x_nchw = jax.random.normal(k2, (Bc, Cc, Hc, Wc), dtype=jnp.float32)
    out2 = jax.block_until_ready(biasfree_layernorm_nchw(x_nchw, weight))
    ref2 = biasfree_layernorm_nchw_ref(x_nchw, weight)
    assert out2.shape == x_nchw.shape and out2.dtype == x_nchw.dtype
    assert jnp.allclose(out2, ref2, atol=1e-5, rtol=1e-4), "nchw mismatch"

    # 3) Ragged token count (exercises padding).
    x_r = jax.random.normal(k3, (3, 100, 48), dtype=jnp.float32)
    w_r = jnp.ones((48,), dtype=jnp.float32)
    out3 = jax.block_until_ready(biasfree_layernorm(x_r, w_r))
    ref3 = biasfree_layernorm_ref(x_r, w_r)
    assert out3.shape == x_r.shape and out3.dtype == x_r.dtype
    assert jnp.allclose(out3, ref3, atol=1e-5, rtol=1e-4), "ragged mismatch"

    # 4) bf16 activations (f32 accumulation inside the kernel).
    x_b = jax.random.normal(k4, (2, 128, 32), dtype=jnp.bfloat16)
    out4 = jax.block_until_ready(biasfree_layernorm(x_b, weight))
    ref4 = biasfree_layernorm_ref(x_b, weight)
    assert out4.shape == x_b.shape and out4.dtype == x_b.dtype
    assert jnp.allclose(out4.astype(jnp.float32), ref4.astype(jnp.float32),
                        atol=2e-2, rtol=2e-2), "bf16 mismatch"

    print("KERNEL_OK")
</pallas_src>

<mosaic_0001>
module attributes {stable_mosaic.version = 11 : i64} {
  func.func @_biasfree_ln_kernel_cl(%arg0: i32, %arg1: memref<512x32xf32, #tpu.memory_space<vmem>>, %arg2: memref<1x32xf32, #tpu.memory_space<vmem>>, %arg3: memref<512x32xf32, #tpu.memory_space<vmem>>) attributes {dimension_semantics = [#tpu.dimension_semantics<parallel>], iteration_bounds = array<i64: 1>, scalar_prefetch = 0 : i64, scratch_operands = 0 : i64, tpu.core_type = #tpu.core_type<tc>, window_params = [{transform_indices = @transform_0, window_bounds = array<i64: 512, 32>}, {pipeline_mode = #tpu.pipeline_mode<synchronous>, transform_indices = @transform_1, window_bounds = array<i64: 1, 32>}, {transform_indices = @transform_2, window_bounds = array<i64: 512, 32>}]} {
    %c0 = arith.constant 0 : index
    %c0_0 = arith.constant 0 : index
    %0 = vector.load %arg1[%c0, %c0_0] : memref<512x32xf32, #tpu.memory_space<vmem>>, vector<512x32xf32>
    %cst = arith.constant dense<0.000000e+00> : vector<512xf32>
    %1 = vector.multi_reduction <add>, %0, %cst [1] : vector<512x32xf32> to vector<512xf32>
    %2 = vector.shape_cast %1 : vector<512xf32> to vector<512x1xf32>
    %3 = arith.mulf %0, %0 : vector<512x32xf32>
    %cst_1 = arith.constant dense<0.000000e+00> : vector<512xf32>
    %4 = vector.multi_reduction <add>, %3, %cst_1 [1] : vector<512x32xf32> to vector<512xf32>
    %5 = vector.shape_cast %4 : vector<512xf32> to vector<512x1xf32>
    %cst_2 = arith.constant 3.125000e-02 : f32
    %6 = vector.broadcast %cst_2 : f32 to vector<512x1xf32>
    %7 = arith.mulf %2, %6 : vector<512x1xf32>
    %cst_3 = arith.constant 3.125000e-02 : f32
    %8 = vector.broadcast %cst_3 : f32 to vector<512x1xf32>
    %9 = arith.mulf %5, %8 : vector<512x1xf32>
    %10 = arith.mulf %7, %7 : vector<512x1xf32>
    %11 = arith.subf %9, %10 : vector<512x1xf32>
    %cst_4 = arith.constant 0.000000e+00 : f32
    %12 = vector.broadcast %cst_4 : f32 to vector<512x1xf32>
    %13 = arith.maximumf %11, %12 : vector<512x1xf32>
    %cst_5 = arith.constant 9.99999974E-6 : f32
    %14 = vector.broadcast %cst_5 : f32 to vector<512x1xf32>
    %15 = arith.addf %13, %14 : vector<512x1xf32>
    %16 = math.rsqrt %15 : vector<512x1xf32>
    %c0_6 = arith.constant 0 : index
    %c0_7 = arith.constant 0 : index
    %17 = vector.load %arg2[%c0_6, %c0_7] : memref<1x32xf32, #tpu.memory_space<vmem>>, vector<1x32xf32>
    %18 = vector.broadcast %16 : vector<512x1xf32> to vector<512x32xf32>
    %19 = arith.mulf %0, %18 : vector<512x32xf32>
    %20 = vector.broadcast %17 : vector<1x32xf32> to vector<512x32xf32>
    %21 = arith.mulf %19, %20 : vector<512x32xf32>
    %c0_8 = arith.constant 0 : index
    %c0_9 = arith.constant 0 : index
    %22 = vector.load %arg3[%c0_8, %c0_9] : memref<512x32xf32, #tpu.memory_space<vmem>>, vector<512x32xf32>
    tpu.vector_store %arg3[%c0_8, %c0_9], %21 {strides = array<i32>} : memref<512x32xf32, #tpu.memory_space<vmem>>, vector<512x32xf32>,
    return
  }
  func.func @transform_0(%arg0: i32) -> (i32, i32) {
    %c0_i32 = arith.constant 0 : i32
    %c0_i32_0 = arith.constant 0 : i32
    return %arg0, %c0_i32 : i32, i32
  }
  func.func @transform_1(%arg0: i32) -> (i32, i32) {
    %c0_i32 = arith.constant 0 : i32
    %c0_i32_0 = arith.constant 0 : i32
    %c0_i32_1 = arith.constant 0 : i32
    return %c0_i32, %c0_i32_0 : i32, i32
  }
  func.func @transform_2(%arg0: i32) -> (i32, i32) {
    %c0_i32 = arith.constant 0 : i32
    %c0_i32_0 = arith.constant 0 : i32
    return %arg0, %c0_i32 : i32, i32
  }
}

</mosaic_0001>

<bundles_post_ra>
// kernel: tpu_custom_call.1
= control target key start
LH: loop header
LB: loop body
LE: loop exit
PB: predicated region body
PF: predicated region fallthrough
CT: control target
= control target key end

     0   :  { %vm75_vm0 = vcmask 261120   ;;  %s4471_s0 = inlined_call_operand.vmem [shape: f32[512,32], index: 0, kind: input, shape index: {}]   ;;  %s4472_s1 = inlined_call_operand.vmem [shape: f32[1,32], index: 1, kind: input, shape index: {}]   ;;  %s4473_s2 = inlined_call_operand.vmem [shape: f32[512,32], index: 2, kind: output, shape index: {}]  }
   0x1   :  { %v1966_v0 = vld [vmem:[%s4471_s0 + $0x20] sm:$0xff]  ;;  %v1971_v1 = vld [vmem:[%s4471_s0 + $0x10] sm:$0xff]  ;;  %v1987_v6 = vld [vmem:[%s4471_s0 + $0x28] sm:$0xff] }
   0x2   :  { %v1976_v2 = vld [vmem:[%s4471_s0] sm:$0xff]  ;;  %v88_v3 = vsel %vm75_vm0, %v1966_v0, 0.0  ;;  %v82_v4 = vsel %vm75_vm0, %v1971_v1, 0.0  ;;  %v1992_v7 = vld [vmem:[%s4471_s0 + $0x18] sm:$0xff]  ;;  %v1997_v8 = vld [vmem:[%s4471_s0 + $0x8] sm:$0xff]  ;;  %v91_v9 = vsel %vm75_vm0, %v1987_v6, 0.0 }
   0x3   :  { %v76_v5 = vsel %vm75_vm0, %v1976_v2, 0.0  ;;  %89 = vadd.xlane.f32.xlu2 %v88_v3  ;;  %83 = vadd.xlane.f32.xlu1 %v82_v4  ;;  %v85_v10 = vsel %vm75_vm0, %v1992_v7, 0.0  ;;  %v79_v11 = vsel %vm75_vm0, %v1997_v8, 0.0  ;;  %v2008_v12 = vld [vmem:[%s4471_s0 + $0x40] sm:$0xff]  ;;  %v2013_v13 = vld [vmem:[%s4471_s0 + $0x38] sm:$0xff]  ;;  %v2018_v14 = vld [vmem:[%s4471_s0 + $0x30] sm:$0xff] }
   0x4   :  { %77 = vadd.xlane.f32.xlu0 %v76_v5  ;;  %v100_v15 = vsel %vm75_vm0, %v2008_v12, 0.0  ;;  %v97_v16 = vsel %vm75_vm0, %v2013_v13, 0.0  ;;  %v94_v17 = vsel %vm75_vm0, %v2018_v14, 0.0  ;;  %v2029_v18 = vld [vmem:[%s4471_s0 + $0x58] sm:$0xff]  ;;  %v2034_v19 = vld [vmem:[%s4471_s0 + $0x50] sm:$0xff]  ;;  %v2039_v20 = vld [vmem:[%s4471_s0 + $0x48] sm:$0xff] }
   0x5   :  { %v109_v21 = vsel %vm75_vm0, %v2029_v18, 0.0  ;;  %v106_v22 = vsel %vm75_vm0, %v2034_v19, 0.0  ;;  %v103_v23 = vsel %vm75_vm0, %v2039_v20, 0.0  ;;  %v2050_v24 = vld [vmem:[%s4471_s0 + $0x70] sm:$0xff]  ;;  %v2055_v25 = vld [vmem:[%s4471_s0 + $0x68] sm:$0xff]  ;;  %v2060_v26 = vld [vmem:[%s4471_s0 + $0x60] sm:$0xff] }
   0x6   :  { %v118_v27 = vsel %vm75_vm0, %v2050_v24, 0.0  ;;  %v115_v28 = vsel %vm75_vm0, %v2055_v25, 0.0  ;;  %v112_v29 = vsel %vm75_vm0, %v2060_v26, 0.0  ;;  %v2071_v30 = vld [vmem:[%s4471_s0 + $0x88] sm:$0xff]  ;;  %v2076_v31 = vld [vmem:[%s4471_s0 + $0x80] sm:$0xff]  ;;  %v2081_v32 = vld [vmem:[%s4471_s0 + $0x78] sm:$0xff] }
   0x7   :  { %v127_v33 = vsel %vm75_vm0, %v2071_v30, 0.0  ;;  %v124_v34 = vsel %vm75_vm0, %v2076_v31, 0.0  ;;  %v121_v35 = vsel %vm75_vm0, %v2081_v32, 0.0  ;;  %v2092_v36 = vld [vmem:[%s4471_s0 + $0xa0] sm:$0xff]  ;;  %v2097_v37 = vld [vmem:[%s4471_s0 + $0x98] sm:$0xff]  ;;  %v2102_v38 = vld [vmem:[%s4471_s0 + $0x90] sm:$0xff] }
   0x8   :  { %v136_v39 = vsel %vm75_vm0, %v2092_v36, 0.0  ;;  %v133_v40 = vsel %vm75_vm0, %v2097_v37, 0.0  ;;  %v130_v41 = vsel %vm75_vm0, %v2102_v38, 0.0  ;;  %v2113_v42 = vld [vmem:[%s4471_s0 + $0xb8] sm:$0xff]  ;;  %v2118_v43 = vld [vmem:[%s4471_s0 + $0xb0] sm:$0xff]  ;;  %v2123_v44 = vld [vmem:[%s4471_s0 + $0xa8] sm:$0xff] }
   0x9   :  { %v145_v45 = vsel %vm75_vm0, %v2113_v42, 0.0  ;;  %v142_v46 = vsel %vm75_vm0, %v2118_v43, 0.0  ;;  %v139_v47 = vsel %vm75_vm0, %v2123_v44, 0.0  ;;  %v2134_v48 = vld [vmem:[%s4471_s0 + $0xd0] sm:$0xff]  ;;  %v2139_v49 = vld [vmem:[%s4471_s0 + $0xc8] sm:$0xff]  ;;  %v2144_v50 = vld [vmem:[%s4471_s0 + $0xc0] sm:$0xff] }
   0xa   :  { %v154_v51 = vsel %vm75_vm0, %v2134_v48, 0.0  ;;  %v151_v52 = vsel %vm75_vm0, %v2139_v49, 0.0  ;;  %v148_v53 = vsel %vm75_vm0, %v2144_v50, 0.0  ;;  %v2155_v54 = vld [vmem:[%s4471_s0 + $0xe8] sm:$0xff]  ;;  %v2160_v55 = vld [vmem:[%s4471_s0 + $0xe0] sm:$0xff]  ;;  %v2165_v56 = vld [vmem:[%s4471_s0 + $0xd8] sm:$0xff] }
   0xb   :  { %92 = vadd.xlane.f32.xlu2 %v91_v9  ;;  %86 = vadd.xlane.f32.xlu1 %v85_v10  ;;  %v163_v57 = vsel %vm75_vm0, %v2155_v54, 0.0  ;;  %v160_v58 = vsel %vm75_vm0, %v2160_v55, 0.0  ;;  %v157_v59 = vsel %vm75_vm0, %v2165_v56, 0.0  ;;  %v2176_v60 = vld [vmem:[%s4471_s0 + $0x100] sm:$0xff]  ;;  %v2181_v61 = vld [vmem:[%s4471_s0 + $0xf8] sm:$0xff]  ;;  %v2186_v62 = vld [vmem:[%s4471_s0 + $0xf0] sm:$0xff] }
   0xc   :  { %80 = vadd.xlane.f32.xlu0 %v79_v11  ;;  %v172_v63 = vsel %vm75_vm0, %v2176_v60, 0.0  ;;  %v169_v3 = vsel %vm75_vm0, %v2181_v61, 0.0  ;;  %v166_v4 = vsel %vm75_vm0, %v2186_v62, 0.0  ;;  %v2197_v5 = vld [vmem:[%s4471_s0 + $0x118] sm:$0xff]  ;;  %v2202_v9 = vld [vmem:[%s4471_s0 + $0x110] sm:$0xff]  ;;  %v2207_v10 = vld [vmem:[%s4471_s0 + $0x108] sm:$0xff] }
   0xd   :  { %v181_v11 = vsel %vm75_vm0, %v2197_v5, 0.0 }
  0x13   :  { %101 = vadd.xlane.f32.xlu2 %v100_v15  ;;  %98 = vadd.xlane.f32.xlu1 %v97_v16  ;;  %v178_v15 = vsel %vm75_vm0, %v2202_v9, 0.0  ;;  %v175_v16 = vsel %vm75_vm0, %v2207_v10, 0.0 }
  0x14   :  { %95 = vadd.xlane.f32.xlu0 %v94_v17  ;;  %v2218_v17 = vld [vmem:[%s4471_s0 + $0x130] sm:$0xff] }
  0x15   :  { %4495 = vst [vmem:[#allocation2_spill] sm:$0xff] %v2218_v17 }
  0x1b   :  { %110 = vadd.xlane.f32.xlu2 %v109_v21  ;;  %107 = vadd.xlane.f32.xlu1 %v106_v22  ;;  %v2223_v21 = vld [vmem:[%s4471_s0 + $0x128] sm:$0xff]  ;;  %v2228_v22 = vld [vmem:[%s4471_s0 + $0x120] sm:$0xff] }
  0x1c   :  { %104 = vadd.xlane.f32.xlu0 %v103_v23  ;;  %v190_v23 = vsel %vm75_vm0, %v2218_v17, 0.0 }
  0x23   :  { %119 = vadd.xlane.f32.xlu2 %v118_v27  ;;  %116 = vadd.xlane.f32.xlu1 %v115_v28  ;;  %v187_v27 = vsel %vm75_vm0, %v2223_v21, 0.0  ;;  %v184_v28 = vsel %vm75_vm0, %v2228_v22, 0.0 }
  0x24   :  { %113 = vadd.xlane.f32.xlu0 %v112_v29  ;;  %v2239_v29 = vld [vmem:[%s4471_s0 + $0x148] sm:$0xff] }
  0x25   :  { %4496 = vst [vmem:[#allocation3_spill] sm:$0xff] %v2239_v29 }
  0x2b   :  { %128 = vadd.xlane.f32.xlu2 %v127_v33  ;;  %125 = vadd.xlane.f32.xlu1 %v124_v34  ;;  %v2244_v33 = vld [vmem:[%s4471_s0 + $0x140] sm:$0xff]  ;;  %v2249_v34 = vld [vmem:[%s4471_s0 + $0x138] sm:$0xff] }
  0x2c   :  { %122 = vadd.xlane.f32.xlu0 %v121_v35  ;;  %4497 = vst [vmem:[#allocation4_spill] sm:$0xff] %v2244_v33  ;;  %v199_v35 = vsel %vm75_vm0, %v2239_v29, 0.0 }
  0x2d   :  { %4498 = vst [vmem:[#allocation5_spill] sm:$0xff] %v2249_v34 }
  0x33   :  { %137 = vadd.xlane.f32.xlu2 %v136_v39  ;;  %134 = vadd.xlane.f32.xlu1 %v133_v40  ;;  %v196_v39 = vsel %vm75_vm0, %v2244_v33, 0.0  ;;  %v193_v40 = vsel %vm75_vm0, %v2249_v34, 0.0  ;;  %v269_v34 = vmul.f32 %v1997_v8, %v1997_v8  ;;  %v268_v33 = vmul.f32 %v1976_v2, %v1976_v2 }
  0x34   :  { %131 = vadd.xlane.f32.xlu0 %v130_v41  ;;  %v2260_v41 = vld [vmem:[%s4471_s0 + $0x160] sm:$0xff]  ;;  %v272_v2 = vmul.f32 %v1966_v0, %v1966_v0  ;;  %v271_v8 = vmul.f32 %v1992_v7, %v1992_v7  ;;  %v275_v0 = vmul.f32 %v2013_v13, %v2013_v13  ;;  %v273_v7 = vmul.f32 %v1987_v6, %v1987_v6 }
  0x35   :  { %4499 = vst [vmem:[#allocation6_spill] sm:$0xff] %v2260_v41  ;;  %v278_v13 = vmul.f32 %v2034_v19, %v2034_v19  ;;  %v277_v6 = vmul.f32 %v2039_v20, %v2039_v20  ;;  %v281_v19 = vmul.f32 %v2055_v25, %v2055_v25  ;;  %v279_v20 = vmul.f32 %v2029_v18, %v2029_v18 }
  0x36   :  { %v284_v25 = vmul.f32 %v2076_v31, %v2076_v31  ;;  %v283_v18 = vmul.f32 %v2081_v32, %v2081_v32  ;;  %v287_v31 = vmul.f32 %v2097_v37, %v2097_v37  ;;  %v285_v32 = vmul.f32 %v2071_v30, %v2071_v30 }
  0x37   :  { %v290_v37 = vmul.f32 %v2118_v43, %v2118_v43  ;;  %v289_v30 = vmul.f32 %v2123_v44, %v2123_v44  ;;  %v293_v43 = vmul.f32 %v2139_v49, %v2139_v49  ;;  %v291_v44 = vmul.f32 %v2113_v42, %v2113_v42 }
  0x38   :  { %v296_v49 = vmul.f32 %v2160_v55, %v2160_v55  ;;  %v295_v42 = vmul.f32 %v2165_v56, %v2165_v56  ;;  %v299_v55 = vmul.f32 %v2181_v61, %v2181_v61  ;;  %v297_v56 = vmul.f32 %v2155_v54, %v2155_v54 }
  0x39   :  { %v302_v61 = vmul.f32 %v2202_v9, %v2202_v9  ;;  %v301_v54 = vmul.f32 %v2207_v10, %v2207_v10 }
  0x3b   :  { %146 = vadd.xlane.f32.xlu2 %v145_v45  ;;  %143 = vadd.xlane.f32.xlu1 %v142_v46  ;;  %v2265_v45 = vld [vmem:[%s4471_s0 + $0x158] sm:$0xff]  ;;  %v2270_v46 = vld [vmem:[%s4471_s0 + $0x150] sm:$0xff] }
  0x3c   :  { %140 = vadd.xlane.f32.xlu0 %v139_v47  ;;  %4500 = vst [vmem:[#allocation7_spill] sm:$0xff] %v2265_v45  ;;  %v208_v47 = vsel %vm75_vm0, %v2260_v41, 0.0 }
  0x3d   :  { %4501 = vst [vmem:[#allocation8_spill] sm:$0xff] %v2270_v46 }
  0x43   :  { %155 = vadd.xlane.f32.xlu2 %v154_v51  ;;  %152 = vadd.xlane.f32.xlu1 %v151_v52  ;;  %v205_v51 = vsel %vm75_vm0, %v2265_v45, 0.0  ;;  %v202_v52 = vsel %vm75_vm0, %v2270_v46, 0.0  ;;  %v73_v46 = vld [vmem:[%s4471_s0 + $0x1f0] sm:$0xff]  ;;  %v72_v45 = vld [vmem:[%s4471_s0 + $0x1e8] sm:$0xff] }
  0x44   :  { %149 = vadd.xlane.f32.xlu0 %v148_v53  ;;  %v2281_v53 = vld [vmem:[%s4471_s0 + $0x178] sm:$0xff] }
  0x45   :  { %4502 = vst [vmem:[#allocation9_spill] sm:$0xff] %v2281_v53 }
  0x4b   :  { %164 = vadd.xlane.f32.xlu2 %v163_v57  ;;  %161 = vadd.xlane.f32.xlu1 %v160_v58  ;;  %v2286_v57 = vld [vmem:[%s4471_s0 + $0x170] sm:$0xff] }
  0x4c   :  { %158 = vadd.xlane.f32.xlu0 %v157_v59  ;;  %4503 = vst [vmem:[#allocation10_spill] sm:$0xff] %v2286_v57 }
  0x53   :  { %173 = vadd.xlane.f32.xlu2 %v172_v63  ;;  %170 = vadd.xlane.f32.xlu1 %v169_v3  ;;  %v2295_v63 = vld [vmem:[%s4471_s0 + $0x168] sm:$0xff] }
  0x54   :  { %167 = vadd.xlane.f32.xlu0 %v166_v4  ;;  %4504 = vst [vmem:[#allocation11_spill] sm:$0xff] %v2295_v63  ;;  %v217_v4 = vsel %vm75_vm0, %v2281_v53, 0.0 }
  0x5b   :  { %182 = vadd.xlane.f32.xlu2 %v181_v11  ;;  %179 = vadd.xlane.f32.xlu1 %v178_v15  ;;  %v214_v11 = vsel %vm75_vm0, %v2286_v57, 0.0  ;;  %v211_v15 = vsel %vm75_vm0, %v2295_v63, 0.0  ;;  %v70_v63 = vld [vmem:[%s4471_s0 + $0x1d8] sm:$0xff]  ;;  %v2392_v57 = vld [vmem:[%s4471_s0 + $0x1d0] sm:$0xff] }
  0x5c   :  { %176 = vadd.xlane.f32.xlu0 %v175_v16  ;;  %v2308_v16 = vld [vmem:[%s4471_s0 + $0x190] sm:$0xff]  ;;  %4514 = vst [vmem:[#allocation21_spill] sm:$0xff] %v2392_v57 }
  0x5d   :  { %4505 = vst [vmem:[#allocation12_spill] sm:$0xff] %v2308_v16 }
  0x63   :  { %191 = vadd.xlane.f32.xlu2 %v190_v23  ;;  %188 = vadd.xlane.f32.xlu1 %v187_v27  ;;  %v2313_v23 = vld [vmem:[%s4471_s0 + $0x188] sm:$0xff] }
  0x64   :  { %185 = vadd.xlane.f32.xlu0 %v184_v28  ;;  %4506 = vst [vmem:[#allocation13_spill] sm:$0xff] %v2313_v23 }
  0x6b   :  { %200 = vadd.xlane.f32.xlu2 %v199_v35  ;;  %197 = vadd.xlane.f32.xlu1 %v196_v39  ;;  %v2322_v35 = vld [vmem:[%s4471_s0 + $0x180] sm:$0xff] }
  0x6c   :  { %194 = vadd.xlane.f32.xlu0 %v193_v40  ;;  %4507 = vst [vmem:[#allocation14_spill] sm:$0xff] %v2322_v35  ;;  %v226_v40 = vsel %vm75_vm0, %v2308_v16, 0.0 }
  0x73   :  { %209 = vadd.xlane.f32.xlu2 %v208_v47  ;;  %206 = vadd.xlane.f32.xlu1 %v205_v51  ;;  %v223_v47 = vsel %vm75_vm0, %v2313_v23, 0.0  ;;  %v220_v51 = vsel %vm75_vm0, %v2322_v35, 0.0  ;;  %v2362_v35 = vld [vmem:[%s4471_s0 + $0x1c0] sm:$0xff]  ;;  %v2367_v23 = vld [vmem:[%s4471_s0 + $0x1b8] sm:$0xff] }
  0x74   :  { %203 = vadd.xlane.f32.xlu0 %v202_v52  ;;  %v2335_v52 = vld [vmem:[%s4471_s0 + $0x1a8] sm:$0xff]  ;;  %4511 = vst [vmem:[#allocation18_spill] sm:$0xff] %v2362_v35 }
  0x75   :  { %4508 = vst [vmem:[#allocation15_spill] sm:$0xff] %v2335_v52 }
  0x76   :  { %v2288_v58 = vpop.xlane.xlu2 %89  ;;  %v2290_v59 = vpop.xlane.xlu1 %83  ;;  %4512 = vst [vmem:[#allocation19_spill] sm:$0xff] %v2367_v23 }
  0x77   :  { %v2297_v3 = vpop.xlane.xlu0 %77  ;;  %v526_v9 = vmul.f32 0.03125, %v2290_v59 }
  0x78   :  { %v524_v10 = vmul.f32 0.03125, %v2297_v3  ;;  %v303_v3 = vmul.f32 %v2197_v5, %v2197_v5 }
  0x7b   :  { %218 = vadd.xlane.f32.xlu2 %v217_v4  ;;  %215 = vadd.xlane.f32.xlu1 %v214_v11  ;;  %v2340_v4 = vld [vmem:[%s4471_s0 + $0x1a0] sm:$0xff] }
  0x7c   :  { %212 = vadd.xlane.f32.xlu0 %v211_v15  ;;  %4509 = vst [vmem:[#allocation16_spill] sm:$0xff] %v2340_v4  ;;  %v232_v16 = vsel %vm75_vm0, %v2340_v4, 0.0 }
  0x7e   :  { %v2315_v27 = vpop.xlane.xlu2 %92  ;;  %v2317_v28 = vpop.xlane.xlu1 %86 }
  0x7f   :  { %v2324_v39 = vpop.xlane.xlu0 %80 }
  0x83   :  { %227 = vadd.xlane.f32.xlu2 %v226_v40  ;;  %224 = vadd.xlane.f32.xlu1 %v223_v47  ;;  %v2349_v40 = vld [vmem:[%s4471_s0 + $0x198] sm:$0xff] }
  0x84   :  { %221 = vadd.xlane.f32.xlu0 %v220_v51  ;;  %4510 = vst [vmem:[#allocation17_spill] sm:$0xff] %v2349_v40  ;;  %v235_v51 = vsel %vm75_vm0, %v2335_v52, 0.0  ;;  %v229_v53 = vsel %vm75_vm0, %v2349_v40, 0.0  ;;  %v241_v40 = vsel %vm75_vm0, %v2367_v23, 0.0 }
  0x86   :  { %v2342_v11 = vpop.xlane.xlu2 %101  ;;  %v2344_v15 = vpop.xlane.xlu1 %98 }
  0x87   :  { %v2351_v47 = vpop.xlane.xlu0 %95 }
  0x8b   :  { %236 = vadd.xlane.f32.xlu2 %v235_v51  ;;  %233 = vadd.xlane.f32.xlu1 %v232_v16  ;;  %v2376_v51 = vld [vmem:[%s4471_s0 + $0x1b0] sm:$0xff]  ;;  %v244_v16 = vsel %vm75_vm0, %v2362_v35, 0.0 }
  0x8c   :  { %230 = vadd.xlane.f32.xlu0 %v229_v53  ;;  %4513 = vst [vmem:[#allocation20_spill] sm:$0xff] %v2376_v51  ;;  %v238_v4 = vsel %vm75_vm0, %v2376_v51, 0.0  ;;  %v2401_v51 = vld [vmem:[%s4471_s0 + $0x1c8] sm:$0xff] }
  0x8d   :  { %4515 = vst [vmem:[#allocation22_spill] sm:$0xff] %v2401_v51  ;;  %v247_v23 = vsel %vm75_vm0, %v2401_v51, 0.0 }
  0x8e   :  { %v2369_v52 = vpop.xlane.xlu2 %110  ;;  %v2371_v41 = vpop.xlane.xlu1 %107 }
  0x8f   :  { %v2378_v53 = vpop.xlane.xlu0 %104  ;;  %v535_v5 = vmul.f32 0.03125, %v2369_v52 }
  0x93   :  { %245 = vadd.xlane.f32.xlu2 %v244_v16  ;;  %242 = vadd.xlane.f32.xlu1 %v241_v40  ;;  %v250_v16 = vsel %vm75_vm0, %v2392_v57, 0.0  ;;  %v71_v57 = vld [vmem:[%s4471_s0 + $0x1e0] sm:$0xff] }
  0x94   :  { %239 = vadd.xlane.f32.xlu0 %v238_v4  ;;  %v253_v4 = vsel %vm75_vm0, %v70_v63, 0.0 }
  0x96   :  { %v2394_v29 = vpop.xlane.xlu2 %119  ;;  %v2396_v35 = vpop.xlane.xlu1 %116 }
  0x97   :  { %v2403_v40 = vpop.xlane.xlu0 %113 }
  0x9b   :  { %254 = vadd.xlane.f32.xlu2 %v253_v4  ;;  %251 = vadd.xlane.f32.xlu1 %v250_v16  ;;  %v259_v4 = vsel %vm75_vm0, %v72_v45, 0.0  ;;  %v256_v16 = vsel %vm75_vm0, %v71_v57, 0.0  ;;  %v335_v57 = vsel %vm75_vm0, %v269_v34, 0.0 }
  0x9c   :  { %248 = vadd.xlane.f32.xlu0 %v247_v23  ;;  %v262_v23 = vsel %vm75_vm0, %v73_v46, 0.0  ;;  %v74_v46 = vld [vmem:[%s4471_s0 + $0x1f8] sm:$0xff] }
  0x9e   :  { %v2416_v17 = vpop.xlane.xlu2 %128  ;;  %v2418_v63 = vpop.xlane.xlu1 %125 }
  0x9f   :  { %4516 = vst [vmem:[#allocation23_spill] sm:$0xff] %v2416_v17  ;;  %v2423_v51 = vpop.xlane.xlu0 %122 }
  0xa0   :  { %4517 = vst [vmem:[#allocation24_spill] sm:$0xff] %v2418_v63 }
  0xa3   :  { %263 = vadd.xlane.f32.xlu2 %v262_v23  ;;  %260 = vadd.xlane.f32.xlu1 %v259_v4  ;;  %v332_v23 = vsel %vm75_vm0, %v268_v33, 0.0  ;;  %v265_v4 = vsel %vm75_vm0, %v74_v46, 0.0  ;;  %v344_v33 = vsel %vm75_vm0, %v272_v2, 0.0  ;;  %v341_v46 = vsel %vm75_vm0, %v271_v8, 0.0 }
  0xa4   :  { %257 = vadd.xlane.f32.xlu0 %v256_v16  ;;  %v270_v16 = vmul.f32 %v1971_v1, %v1971_v1  ;;  %v274_v1 = vmul.f32 %v2018_v14, %v2018_v14  ;;  %v353_v8 = vsel %vm75_vm0, %v275_v0, 0.0  ;;  %v276_v14 = vmul.f32 %v2008_v12, %v2008_v12 }
  0xa5   :  { %v280_v12 = vmul.f32 %v2060_v26, %v2060_v26  ;;  %v282_v26 = vmul.f32 %v2050_v24, %v2050_v24  ;;  %v286_v24 = vmul.f32 %v2102_v38, %v2102_v38  ;;  %v288_v38 = vmul.f32 %v2092_v36, %v2092_v36 }
  0xa6   :  { %v2432_v63 = vpop.xlane.xlu2 %137  ;;  %v2434_v17 = vpop.xlane.xlu1 %134  ;;  %v292_v36 = vmul.f32 %v2144_v50, %v2144_v50  ;;  %v294_v50 = vmul.f32 %v2134_v48, %v2134_v48  ;;  %v298_v48 = vmul.f32 %v2186_v62, %v2186_v62  ;;  %v300_v62 = vmul.f32 %v2176_v60, %v2176_v60  ;;  %v4525_v52 = vld [vmem:[#allocation23_spill] sm:$0xff] }
  0xa7   :  { %4518 = vst [vmem:[#allocation25_spill] sm:$0xff] %v2434_v17  ;;  %v2439_v45 = vpop.xlane.xlu0 %131  ;;  %v529_v60 = vmul.f32 0.03125, %v2315_v27  ;;  %v2625_v27 = vmul.f32 %v524_v10, %v524_v10  ;;  %v533_v10 = vmul.f32 0.03125, %v2378_v53  ;;  %v539_v53 = vmul.f32 0.03125, %v2423_v51 }
  0xa8   :  { %4519 = vst [vmem:[#allocation26_spill] sm:$0xff] %v2439_v45 }
  0xab   :  { %336 = vadd.xlane.f32.xlu2 %v335_v57  ;;  %333 = vadd.xlane.f32.xlu1 %v332_v23  ;;  %v338_v57 = vsel %vm75_vm0, %v270_v16, 0.0  ;;  %v350_v16 = vsel %vm75_vm0, %v274_v1, 0.0  ;;  %v362_v1 = vsel %vm75_vm0, %v278_v13, 0.0 }
  0xac   :  { %266 = vadd.xlane.f32.xlu0 %v265_v4 }
  0xae   :  { %v2450_v17 = vpop.xlane.xlu2 %146  ;;  %v2452_v45 = vpop.xlane.xlu1 %143 }
  0xaf   :  { %v2454_v34 = vpop.xlane.xlu0 %140 }
  0xb3   :  { %345 = vadd.xlane.f32.xlu2 %v344_v33  ;;  %342 = vadd.xlane.f32.xlu1 %v341_v46  ;;  %v347_v33 = vsel %vm75_vm0, %v273_v7, 0.0  ;;  %v359_v7 = vsel %vm75_vm0, %v277_v6, 0.0  ;;  %v371_v6 = vsel %vm75_vm0, %v281_v19, 0.0 }
  0xb4   :  { %339 = vadd.xlane.f32.xlu0 %v338_v57 }
  0xb6   :  { %v2465_v23 = vpop.xlane.xlu2 %155  ;;  %v2467_v4 = vpop.xlane.xlu1 %152 }
  0xb7   :  { %v2469_v2 = vpop.xlane.xlu0 %149 }
  0xbb   :  { %354 = vadd.xlane.f32.xlu2 %v353_v8  ;;  %351 = vadd.xlane.f32.xlu1 %v350_v16  ;;  %v356_v8 = vsel %vm75_vm0, %v276_v14, 0.0  ;;  %v368_v14 = vsel %vm75_vm0, %v280_v12, 0.0  ;;  %v380_v12 = vsel %vm75_vm0, %v284_v25, 0.0 }
  0xbc   :  { %348 = vadd.xlane.f32.xlu0 %v347_v33 }
  0xbe   :  { %v2480_v46 = vpop.xlane.xlu2 %164  ;;  %v2482_v57 = vpop.xlane.xlu1 %161 }
  0xbf   :  { %v2484_v0 = vpop.xlane.xlu0 %158 }
  0xc3   :  { %363 = vadd.xlane.f32.xlu2 %v362_v1  ;;  %360 = vadd.xlane.f32.xlu1 %v359_v7  ;;  %v365_v1 = vsel %vm75_vm0, %v279_v20, 0.0  ;;  %v377_v20 = vsel %vm75_vm0, %v283_v18, 0.0  ;;  %v389_v18 = vsel %vm75_vm0, %v287_v31, 0.0 }
  0xc4   :  { %357 = vadd.xlane.f32.xlu0 %v356_v8 }
  0xc6   :  { %v2495_v16 = vpop.xlane.xlu2 %173  ;;  %v2497_v33 = vpop.xlane.xlu1 %170 }
  0xc7   :  { %v2499_v13 = vpop.xlane.xlu0 %167 }
  0xcb   :  { %372 = vadd.xlane.f32.xlu2 %v371_v6  ;;  %369 = vadd.xlane.f32.xlu1 %v368_v14  ;;  %v374_v6 = vsel %vm75_vm0, %v282_v26, 0.0  ;;  %v386_v26 = vsel %vm75_vm0, %v286_v24, 0.0  ;;  %v398_v24 = vsel %vm75_vm0, %v290_v37, 0.0 }
  0xcc   :  { %366 = vadd.xlane.f32.xlu0 %v365_v1 }
  0xce   :  { %v2510_v7 = vpop.xlane.xlu2 %182  ;;  %v2512_v8 = vpop.xlane.xlu1 %179 }
  0xcf   :  { %v2514_v19 = vpop.xlane.xlu0 %176 }
  0xd3   :  { %381 = vadd.xlane.f32.xlu2 %v380_v12  ;;  %378 = vadd.xlane.f32.xlu1 %v377_v20  ;;  %v383_v12 = vsel %vm75_vm0, %v285_v32, 0.0  ;;  %v395_v32 = vsel %vm75_vm0, %v289_v30, 0.0  ;;  %v407_v30 = vsel %vm75_vm0, %v293_v43, 0.0 }
  0xd4   :  { %375 = vadd.xlane.f32.xlu0 %v374_v6 }
  0xd6   :  { %v2525_v14 = vpop.xlane.xlu2 %191  ;;  %v2527_v1 = vpop.xlane.xlu1 %188 }
  0xd7   :  { %v2529_v25 = vpop.xlane.xlu0 %185 }
  0xdb   :  { %390 = vadd.xlane.f32.xlu2 %v389_v18  ;;  %387 = vadd.xlane.f32.xlu1 %v386_v26  ;;  %v392_v18 = vsel %vm75_vm0, %v288_v38, 0.0  ;;  %v404_v38 = vsel %vm75_vm0, %v292_v36, 0.0  ;;  %v416_v36 = vsel %vm75_vm0, %v296_v49, 0.0 }
  0xdc   :  { %384 = vadd.xlane.f32.xlu0 %v383_v12 }
  0xde   :  { %v2540_v20 = vpop.xlane.xlu2 %200  ;;  %v2542_v6 = vpop.xlane.xlu1 %197 }
  0xdf   :  { %v2544_v31 = vpop.xlane.xlu0 %194 }
  0xe3   :  { %399 = vadd.xlane.f32.xlu2 %v398_v24  ;;  %396 = vadd.xlane.f32.xlu1 %v395_v32  ;;  %v401_v24 = vsel %vm75_vm0, %v291_v44, 0.0  ;;  %v413_v44 = vsel %vm75_vm0, %v295_v42, 0.0  ;;  %v425_v42 = vsel %vm75_vm0, %v299_v55, 0.0 }
  0xe4   :  { %393 = vadd.xlane.f32.xlu0 %v392_v18 }
  0xe6   :  { %v2555_v26 = vpop.xlane.xlu2 %209  ;;  %v2557_v12 = vpop.xlane.xlu1 %206 }
  0xe7   :  { %v2559_v37 = vpop.xlane.xlu0 %203 }
  0xeb   :  { %408 = vadd.xlane.f32.xlu2 %v407_v30  ;;  %405 = vadd.xlane.f32.xlu1 %v404_v38  ;;  %v410_v30 = vsel %vm75_vm0, %v294_v50, 0.0  ;;  %v422_v50 = vsel %vm75_vm0, %v298_v48, 0.0  ;;  %v434_v48 = vsel %vm75_vm0, %v302_v61, 0.0  ;;  %v305_v61 = vmul.f32 %v2223_v21, %v2223_v21 }
  0xec   :  { %402 = vadd.xlane.f32.xlu0 %v401_v24 }
  0xee   :  { %v2570_v32 = vpop.xlane.xlu2 %218  ;;  %v2572_v18 = vpop.xlane.xlu1 %215 }
  0xef   :  { %v2574_v43 = vpop.xlane.xlu0 %212 }
  0xf3   :  { %417 = vadd.xlane.f32.xlu2 %v416_v36  ;;  %414 = vadd.xlane.f32.xlu1 %v413_v44  ;;  %v419_v36 = vsel %vm75_vm0, %v297_v56, 0.0  ;;  %v431_v56 = vsel %vm75_vm0, %v301_v54, 0.0  ;;  %v2621_v54 = vmul.f32 %v526_v9, %v526_v9 }
  0xf4   :  { %411 = vadd.xlane.f32.xlu0 %v410_v30 }
  0xf5   :  { %4521 = vst [vmem:[#allocation28_spill] sm:$0xff] %v2621_v54  ;;  %v4526_v54 = vld [vmem:[#allocation24_spill] sm:$0xff] }
  0xf6   :  { %v2585_v38 = vpop.xlane.xlu2 %227  ;;  %v2587_v24 = vpop.xlane.xlu1 %224 }
  0xf7   :  { %v2589_v49 = vpop.xlane.xlu0 %221 }
  0xfb   :  { %426 = vadd.xlane.f32.xlu2 %v425_v42  ;;  %423 = vadd.xlane.f32.xlu1 %v422_v50  ;;  %v528_v42 = vmul.f32 0.03125, %v2288_v58  ;;  %v428_v50 = vsel %vm75_vm0, %v300_v62, 0.0  ;;  %v304_v58 = vmul.f32 %v2228_v22, %v2228_v22  ;;  %v532_v62 = vmul.f32 0.03125, %v2342_v11 }
  0xfc   :  { %420 = vadd.xlane.f32.xlu0 %v419_v36  ;;  %v527_v36 = vmul.f32 0.03125, %v2317_v28  ;;  %v2627_v28 = vmul.f32 %v529_v60, %v529_v60  ;;  %v443_v11 = vsel %vm75_vm0, %v305_v61, 0.0 }
  0xfd   :  { %v2619_v59 = vmul.f32 %v528_v42, %v528_v42  ;;  %v530_v42 = vmul.f32 0.03125, %v2351_v47  ;;  %v440_v60 = vsel %vm75_vm0, %v304_v58, 0.0  ;;  %v437_v47 = vsel %vm75_vm0, %v303_v3, 0.0  ;;  %v4527_v3 = vld [vmem:[#allocation4_spill] sm:$0xff] }
  0xfe   :  { %v2600_v44 = vpop.xlane.xlu2 %236  ;;  %v2602_v30 = vpop.xlane.xlu1 %233  ;;  %4522 = vst [vmem:[#allocation29_spill] sm:$0xff] %v2627_v28  ;;  %v2651_v28 = vmul.f32 %v532_v62, %v532_v62  ;;  %v2660_v58 = vmul.f32 %v535_v5, %v535_v5  ;;  %v4528_v62 = vld [vmem:[#allocation5_spill] sm:$0xff] }
  0xff   :  { %4520 = vst [vmem:[#allocation27_spill] sm:$0xff] %v2602_v30  ;;  %v2604_v55 = vpop.xlane.xlu0 %230  ;;  %v525_v30 = vmul.f32 0.03125, %v2324_v39  ;;  %v2629_v39 = vmul.f32 %v527_v36, %v527_v36  ;;  %v538_v36 = vmul.f32 0.03125, %v2394_v29  ;;  %v2658_v61 = vmul.f32 %v530_v42, %v530_v42 }
 0x100   :  { %v544_v29 = vmul.f32 0.03125, %v2432_v63  ;;  %v307_v51 = vmul.f32 %v4528_v62, %v4528_v62  ;;  %v4530_v63 = vld [vmem:[#allocation2_spill] sm:$0xff] }
 0x101   :  { %4523 = vst [vmem:[#allocation30_spill] sm:$0xff] %v2629_v39  ;;  %v2636_v22 = vmul.f32 %v525_v30, %v525_v30  ;;  %v537_v30 = vmul.f32 0.03125, %v2396_v35 }
 0x103   :  { %435 = vadd.xlane.f32.xlu2 %v434_v48  ;;  %432 = vadd.xlane.f32.xlu1 %v431_v56  ;;  %v531_v56 = vmul.f32 0.03125, %v2344_v15  ;;  %v536_v15 = vmul.f32 0.03125, %v2403_v40  ;;  %v2665_v40 = vmul.f32 %v533_v10, %v533_v10  ;;  %v2673_v42 = vmul.f32 %v537_v30, %v537_v30  ;;  %v4535_v30 = vld [vmem:[#allocation26_spill] sm:$0xff] }
 0x104   :  { %429 = vadd.xlane.f32.xlu0 %v428_v50  ;;  %v534_v50 = vmul.f32 0.03125, %v2371_v41  ;;  %v540_v41 = vmul.f32 0.03125, %v4526_v54  ;;  %v308_v54 = vmul.f32 %v4527_v3, %v4527_v3 }
 0x105   :  { %v2656_v39 = vmul.f32 %v531_v56, %v531_v56  ;;  %v2671_v56 = vmul.f32 %v538_v36, %v538_v36  ;;  %v2675_v5 = vmul.f32 %v536_v15, %v536_v15  ;;  %v2690_v36 = vmul.f32 %v544_v29, %v544_v29 }
 0x106   :  { %v2632_v48 = vpop.xlane.xlu2 %245  ;;  %v2634_v21 = vpop.xlane.xlu1 %242  ;;  %v2663_v35 = vmul.f32 %v534_v50, %v534_v50  ;;  %v2681_v10 = vmul.f32 %v540_v41, %v540_v41  ;;  %v542_v15 = vmul.f32 0.03125, %v4535_v30  ;;  %v545_v41 = vmul.f32 0.03125, %v2454_v34 }
 0x107   :  { %v2641_v9 = vpop.xlane.xlu0 %239  ;;  %4529 = vst [vmem:[#allocation23_spill] sm:$0xff] %v2671_v56  ;;  %v547_v56 = vmul.f32 0.03125, %v2450_v17  ;;  %v548_v29 = vmul.f32 0.03125, %v2469_v2  ;;  %v553_v30 = vmul.f32 0.03125, %v2480_v46  ;;  %v551_v34 = vmul.f32 0.03125, %v2484_v0 }
 0x108   :  { %4524 = vst [vmem:[#allocation31_spill] sm:$0xff] %v2641_v9  ;;  %v541_v9 = vmul.f32 0.03125, %v4525_v52  ;;  %v2717_v2 = vmul.f32 %v545_v41, %v545_v41 }
 0x109   :  { %4534 = vst [vmem:[#allocation5_spill] sm:$0xff] %v2690_v36  ;;  %v2735_v41 = vmul.f32 %v551_v34, %v551_v34  ;;  %v562_v34 = vmul.f32 0.03125, %v2525_v14  ;;  %v568_v14 = vmul.f32 0.03125, %v2555_v26 }
 0x10a   :  { %v2679_v50 = vmul.f32 %v541_v9, %v541_v9 }
 0x10b   :  { %444 = vadd.xlane.f32.xlu2 %v443_v11  ;;  %441 = vadd.xlane.f32.xlu1 %v440_v60  ;;  %v306_v11 = vmul.f32 %v4530_v63, %v4530_v63  ;;  %v2683_v60 = vmul.f32 %v539_v53, %v539_v53  ;;  %v546_v63 = vmul.f32 0.03125, %v2452_v45  ;;  %v550_v53 = vmul.f32 0.03125, %v2465_v23 }
 0x10c   :  { %438 = vadd.xlane.f32.xlu0 %v437_v47  ;;  %v4531_v47 = vld [vmem:[#allocation25_spill] sm:$0xff]  ;;  %v552_v45 = vmul.f32 0.03125, %v2482_v57  ;;  %v556_v23 = vmul.f32 0.03125, %v2495_v16  ;;  %v4537_v57 = vld [vmem:[#allocation7_spill] sm:$0xff] }
 0x10d   :  { %v543_v52 = vmul.f32 0.03125, %v4531_v47  ;;  %v452_v47 = vsel %vm75_vm0, %v308_v54, 0.0  ;;  %v446_v17 = vsel %vm75_vm0, %v306_v11, 0.0  ;;  %v2712_v54 = vmul.f32 %v547_v56, %v547_v56  ;;  %v4538_v11 = vld [vmem:[#allocation8_spill] sm:$0xff] }
 0x10e   :  { %v2686_v3 = vpop.xlane.xlu2 %254  ;;  %v2688_v62 = vpop.xlane.xlu1 %251  ;;  %v2719_v46 = vmul.f32 %v550_v53, %v550_v53  ;;  %v311_v0 = vmul.f32 %v4537_v57, %v4537_v57  ;;  %v310_v16 = vmul.f32 %v4538_v11, %v4538_v11  ;;  %v2727_v56 = vmul.f32 %v548_v29, %v548_v29 }
 0x10f   :  { %4532 = vst [vmem:[#allocation24_spill] sm:$0xff] %v2686_v3  ;;  %v2695_v9 = vpop.xlane.xlu0 %248  ;;  %v449_v3 = vsel %vm75_vm0, %v307_v51, 0.0  ;;  %v2705_v36 = vmul.f32 %v543_v52, %v543_v52  ;;  %v2714_v51 = vmul.f32 %v546_v63, %v546_v63  ;;  %v2733_v63 = vmul.f32 %v552_v45, %v552_v45 }
 0x110   :  { %4533 = vst [vmem:[#allocation4_spill] sm:$0xff] %v2688_v62  ;;  %v549_v62 = vmul.f32 0.03125, %v2467_v4  ;;  %v555_v4 = vmul.f32 0.03125, %v2497_v33  ;;  %v4539_v33 = vld [vmem:[#allocation3_spill] sm:$0xff]  ;;  %v2737_v53 = vmul.f32 %v556_v23, %v556_v23  ;;  %v559_v29 = vmul.f32 0.03125, %v2510_v7 }
 0x111   :  { %4536 = vst [vmem:[#allocation2_spill] sm:$0xff] %v2695_v9  ;;  %v2710_v9 = vmul.f32 %v542_v15, %v542_v15  ;;  %v2729_v15 = vmul.f32 %v553_v30, %v553_v30  ;;  %v558_v30 = vmul.f32 0.03125, %v2512_v8  ;;  %v557_v11 = vmul.f32 0.03125, %v2514_v19 }
 0x112   :  { %v2725_v52 = vmul.f32 %v549_v62, %v549_v62  ;;  %v2744_v62 = vmul.f32 %v555_v4, %v555_v4  ;;  %v561_v23 = vmul.f32 0.03125, %v2527_v1  ;;  %v565_v4 = vmul.f32 0.03125, %v2540_v20 }
 0x113   :  { %453 = vadd.xlane.f32.xlu2 %v452_v47  ;;  %450 = vadd.xlane.f32.xlu1 %v449_v3  ;;  %v309_v3 = vmul.f32 %v4539_v33, %v4539_v33  ;;  %v554_v47 = vmul.f32 0.03125, %v2499_v13  ;;  %v461_v13 = vsel %vm75_vm0, %v311_v0, 0.0  ;;  %v458_v33 = vsel %vm75_vm0, %v310_v16, 0.0 }
 0x114   :  { %447 = vadd.xlane.f32.xlu0 %v446_v17  ;;  %v564_v7 = vmul.f32 0.03125, %v2542_v6  ;;  %v563_v19 = vmul.f32 0.03125, %v2544_v31  ;;  %v567_v1 = vmul.f32 0.03125, %v2557_v12  ;;  %v2766_v0 = vmul.f32 %v558_v30, %v558_v30  ;;  %v4544_v6 = vld [vmem:[#allocation10_spill] sm:$0xff] }
 0x115   :  { %v455_v8 = vsel %vm75_vm0, %v309_v3, 0.0  ;;  %v2768_v16 = vmul.f32 %v557_v11, %v557_v11  ;;  %v2772_v20 = vmul.f32 %v561_v23, %v561_v23  ;;  %v314_v31 = vmul.f32 %v4544_v6, %v4544_v6  ;;  %v4545_v3 = vld [vmem:[#allocation11_spill] sm:$0xff]  ;;  %v4547_v30 = vld [vmem:[#allocation6_spill] sm:$0xff] }
 0x116   :  { %v2740_v17 = vpop.xlane.xlu2 %263  ;;  %v2742_v57 = vpop.xlane.xlu1 %260  ;;  %v313_v26 = vmul.f32 %v4545_v3, %v4545_v3  ;;  %v312_v11 = vmul.f32 %v4547_v30, %v4547_v30  ;;  %v2788_v23 = vmul.f32 %v568_v14, %v568_v14  ;;  %v569_v30 = vmul.f32 0.03125, %v2574_v43 }
 0x117   :  { %4540 = vst [vmem:[#allocation25_spill] sm:$0xff] %v2740_v17  ;;  %v2749_v45 = vpop.xlane.xlu0 %257  ;;  %v2759_v17 = vmul.f32 %v554_v47, %v554_v47  ;;  %v2780_v47 = vmul.f32 %v565_v4, %v565_v4  ;;  %v570_v4 = vmul.f32 0.03125, %v2572_v18  ;;  %v470_v14 = vsel %vm75_vm0, %v314_v31, 0.0 }
 0x118   :  { %4541 = vst [vmem:[#allocation26_spill] sm:$0xff] %v2742_v57  ;;  %v560_v57 = vmul.f32 0.03125, %v2529_v25  ;;  %v2770_v25 = vmul.f32 %v562_v34, %v562_v34  ;;  %v2786_v34 = vmul.f32 %v563_v19, %v563_v19  ;;  %v574_v19 = vmul.f32 0.03125, %v2585_v38 }
 0x119   :  { %4542 = vst [vmem:[#allocation7_spill] sm:$0xff] %v2749_v45  ;;  %v2764_v45 = vmul.f32 %v559_v29, %v559_v29  ;;  %v2782_v29 = vmul.f32 %v564_v7, %v564_v7  ;;  %v464_v18 = vsel %vm75_vm0, %v312_v11, 0.0  ;;  %v577_v43 = vmul.f32 0.03125, %v2600_v44 }
 0x11a   :  { %4543 = vst [vmem:[#allocation8_spill] sm:$0xff] %v2770_v25  ;;  %v2778_v12 = vmul.f32 %v560_v57, %v560_v57  ;;  %v571_v57 = vmul.f32 0.03125, %v2570_v32  ;;  %v2816_v11 = vmul.f32 %v569_v30, %v569_v30 }
 0x11b   :  { %462 = vadd.xlane.f32.xlu2 %v461_v13  ;;  %459 = vadd.xlane.f32.xlu1 %v458_v33  ;;  %4546 = vst [vmem:[#allocation3_spill] sm:$0xff] %v2780_v47  ;;  %v2790_v13 = vmul.f32 %v567_v1, %v567_v1  ;;  %v566_v33 = vmul.f32 0.03125, %v2559_v37  ;;  %v467_v1 = vsel %vm75_vm0, %v313_v26, 0.0  ;;  %v573_v37 = vmul.f32 0.03125, %v2587_v24  ;;  %v4554_v24 = vld [vmem:[#allocation13_spill] sm:$0xff] }
 0x11c   :  { %456 = vadd.xlane.f32.xlu0 %v455_v8  ;;  %4548 = vst [vmem:[#allocation10_spill] sm:$0xff] %v2788_v23 }
 0x11d   :  { %4549 = vst [vmem:[#allocation11_spill] sm:$0xff] %v2790_v13  ;;  %v2810_v13 = vmul.f32 %v571_v57, %v571_v57 }
 0x11e   :  { %v337_v8 = vpop.xlane.xlu2 %336  ;;  %v334_v6 = vpop.xlane.xlu1 %333  ;;  %4556 = vst [vmem:[#allocation33_spill] sm:$0xff] %v2816_v11 }
 0x11f   :  { %v589_v3 = vmul.f32 0.03125, %v337_v8  ;;  %v588_v7 = vmul.f32 0.03125, %v334_v6  ;;  %v2795_v47 = vpop.xlane.xlu0 %266  ;;  %v2805_v8 = vmul.f32 %v566_v33, %v566_v33  ;;  %v572_v6 = vmul.f32 0.03125, %v2589_v49  ;;  %v4558_v49 = vld [vmem:[#allocation14_spill] sm:$0xff] }
 0x120   :  { %4550 = vst [vmem:[#allocation6_spill] sm:$0xff] %v2795_v47  ;;  %v4552_v47 = vld [vmem:[#allocation27_spill] sm:$0xff]  ;;  %v2818_v33 = vmul.f32 %v574_v19, %v574_v19  ;;  %v316_v44 = vmul.f32 %v4558_v49, %v4558_v49  ;;  %v575_v19 = vmul.f32 0.03125, %v2604_v55 }
 0x121   :  { %v717_v23 = vsub.f32 %v589_v3, %v2636_v22  ;;  %v716_v32 = vsub.f32 %v588_v7, %v2625_v27  ;;  %4551 = vst [vmem:[#allocation32_spill] sm:$0xff] %v2805_v8  ;;  %v576_v38 = vmul.f32 0.03125, %v4552_v47  ;;  %v317_v22 = vmul.f32 %v4554_v24, %v4554_v24  ;;  %v4560_v3 = vld [vmem:[#allocation9_spill] sm:$0xff] }
 0x122   :  { %4553 = vst [vmem:[#allocation27_spill] sm:$0xff] %v2810_v13  ;;  %v2814_v27 = vmul.f32 %v570_v4, %v570_v4  ;;  %v2822_v47 = vmul.f32 %v573_v37, %v573_v37  ;;  %v315_v7 = vmul.f32 %v4560_v3, %v4560_v3  ;;  %v2832_v4 = vmul.f32 %v577_v43, %v577_v43  ;;  %v4564_v3 = vld [vmem:[#allocation16_spill] sm:$0xff]  ;;  %v4568_v13 = vld [vmem:[#allocation17_spill] sm:$0xff] }
 0x123   :  { %v781_v31 = vmax.f32 %v717_v23, 0.0  ;;  %v780_v26 = vmax.f32 %v716_v32, 0.0  ;;  %471 = vadd.xlane.f32.xlu2 %v470_v14  ;;  %468 = vadd.xlane.f32.xlu1 %v467_v1  ;;  %4557 = vst [vmem:[#allocation34_spill] sm:$0xff] %v2818_v33  ;;  %v2830_v14 = vmul.f32 %v572_v6, %v572_v6  ;;  %v2834_v30 = vmul.f32 %v576_v38, %v576_v38 }
 0x124   :  { %4555 = vst [vmem:[#allocation13_spill] sm:$0xff] %v2814_v27  ;;  %465 = vadd.xlane.f32.xlu0 %v464_v18  ;;  %v580_v37 = vmul.f32 0.03125, %v2632_v48  ;;  %v476_v43 = vsel %vm75_vm0, %v316_v44, 0.0  ;;  %v579_v38 = vmul.f32 0.03125, %v2634_v21  ;;  %v473_v49 = vsel %vm75_vm0, %v315_v7, 0.0 }
 0x125   :  { %4559 = vst [vmem:[#allocation14_spill] sm:$0xff] %v2822_v47  ;;  %v2824_v57 = vadd.f32 1e-05, %v781_v31  ;;  %v2826_v23 = vadd.f32 1e-05, %v780_v26  ;;  %v479_v26 = vsel %vm75_vm0, %v317_v22, 0.0  ;;  %v320_v48 = vmul.f32 %v4564_v3, %v4564_v3 }
 0x126   :  { %4561 = vst [vmem:[#allocation9_spill] sm:$0xff] %v2830_v14  ;;  %v346_v1 = vpop.xlane.xlu2 %345  ;;  %v343_v32 = vpop.xlane.xlu1 %342  ;;  %v4567_v22 = vld [vmem:[#allocation28_spill] sm:$0xff]  ;;  %v4576_v47 = vld [vmem:[#allocation21_spill] sm:$0xff] }
 0x127   :  { %4562 = vst [vmem:[#allocation35_spill] sm:$0xff] %v2832_v4  ;;  %1749 = vrsqrt.f32 %v2824_v57  ;;  %v592_v18 = vmul.f32 0.03125, %v346_v1  ;;  %v340_v31 = vpop.xlane.xlu0 %339  ;;  %v591_v6 = vmul.f32 0.03125, %v343_v32  ;;  %v2847_v4 = vmul.f32 %v575_v19, %v575_v19  ;;  %v4566_v1 = vld [vmem:[#allocation30_spill] sm:$0xff] }
 0x128   :  { %4563 = vst [vmem:[#allocation36_spill] sm:$0xff] %v2834_v30  ;;  %1751 = vrsqrt.f32 %v2826_v23  ;;  %v590_v24 = vmul.f32 0.03125, %v340_v31  ;;  %v319_v32 = vmul.f32 %v4568_v13, %v4568_v13  ;;  %v4569_v31 = vld [vmem:[#allocation31_spill] sm:$0xff]  ;;  %vm924_vm1 = vweird.f32 %v2824_v57 }
 0x129   :  { %v720_v55 = vsub.f32 %v592_v18, %v2619_v59  ;;  %4565 = vst [vmem:[#allocation16_spill] sm:$0xff] %v2847_v4  ;;  %v719_v33 = vsub.f32 %v591_v6, %v4566_v1  ;;  %v2854_v44 = vmul.f32 0.03125, %v4569_v31  ;;  %v4570_v59 = vld [vmem:[#allocation12_spill] sm:$0xff]  ;;  %v4571_v18 = vld [vmem:[#allocation19_spill] sm:$0xff]  ;;  %v488_v31 = vsel %vm75_vm0, %v320_v48, 0.0 }
 0x12a   :  { %v718_v30 = vsub.f32 %v590_v24, %v4567_v22  ;;  %v318_v7 = vmul.f32 %v4570_v59, %v4570_v59  ;;  %v323_v19 = vmul.f32 %v4571_v18, %v4571_v18  ;;  %v4572_v6 = vld [vmem:[#allocation20_spill] sm:$0xff]  ;;  %v4573_v1 = vld [vmem:[#allocation15_spill] sm:$0xff]  ;;  %vm914_vm2 = vweird.f32 %v2826_v23 }
 0x12b   :  { %v784_v21 = vmax.f32 %v720_v55, 0.0  ;;  %480 = vadd.xlane.f32.xlu2 %v479_v26  ;;  %477 = vadd.xlane.f32.xlu1 %v476_v43  ;;  %v783_v3 = vmax.f32 %v719_v33, 0.0  ;;  %v322_v24 = vmul.f32 %v4572_v6, %v4572_v6  ;;  %v321_v13 = vmul.f32 %v4573_v1, %v4573_v1 }
 0x12c   :  { %v782_v4 = vmax.f32 %v718_v30, 0.0  ;;  %474 = vadd.xlane.f32.xlu0 %v473_v49  ;;  %v2866_v55 = vmul.f32 %v580_v37, %v580_v37  ;;  %v2868_v26 = vmul.f32 %v579_v38, %v579_v38  ;;  %v485_v37 = vsel %vm75_vm0, %v319_v32, 0.0 }
 0x12d   :  { %v2864_v22 = vpop.eup %1749  ;;  %v2870_v43 = vadd.f32 1e-05, %v784_v21  ;;  %v2877_v30 = vadd.f32 1e-05, %v783_v3  ;;  %v482_v48 = vsel %vm75_vm0, %v318_v7, 0.0  ;;  %v2887_v1 = vsel %vm75_vm0, %v323_v19, 0.0 }
 0x12e   :  { %4574 = vst [vmem:[#allocation30_spill] sm:$0xff] %v2866_v55  ;;  %v2873_v59 = vpop.eup %1751  ;;  %v919_v33 = vmul.f32 %v2864_v22, %v2824_v57  ;;  %v2879_v49 = vadd.f32 1e-05, %v782_v4  ;;  %v355_v18 = vpop.xlane.xlu2 %354  ;;  %v2892_v4 = vsel %vm75_vm0, %v322_v24, 0.0  ;;  %v2895_v32 = vsel %vm75_vm0, %v321_v13, 0.0 }
 0x12f   :  { %4575 = vst [vmem:[#allocation28_spill] sm:$0xff] %v2868_v26  ;;  %v352_v6 = vpop.xlane.xlu1 %351  ;;  %v909_v38 = vmul.f32 %v2873_v59, %v2826_v23  ;;  %1753 = vrsqrt.f32 %v2870_v43  ;;  %v349_v21 = vpop.xlane.xlu0 %348  ;;  %v595_v26 = vmul.f32 0.03125, %v355_v18  ;;  %vm925_vm3 = vweird.f32 %v2864_v22  ;;  %v4577_v18 = vld [vmem:[#allocation29_spill] sm:$0xff] }
 0x130   :  { %v920_v3 = vmul.f32 %v2864_v22, %v919_v33  ;;  %1755 = vrsqrt.f32 %v2877_v30  ;;  %v594_v14 = vmul.f32 0.03125, %v352_v6  ;;  %v593_v19 = vmul.f32 0.03125, %v349_v21  ;;  %vm926_vm6 = vmor %vm924_vm1, %vm925_vm3 }
 0x131   :  { %v910_v55 = vmul.f32 %v2873_v59, %v909_v38  ;;  %1757 = vrsqrt.f32 %v2879_v49  ;;  %v326_v33 = vmul.f32 %v4576_v47, %v4576_v47  ;;  %v723_v24 = vsub.f32 %v595_v26, %v2656_v39  ;;  %v4579_v39 = vld [vmem:[#allocation18_spill] sm:$0xff] }
 0x132   :  { %v921_v7 = vmul.f32 0.5, %v920_v3  ;;  %v722_v13 = vsub.f32 %v594_v14, %v2658_v61  ;;  %v721_v6 = vsub.f32 %v593_v19, %v4577_v18  ;;  %v4578_v3 = vld [vmem:[#allocation22_spill] sm:$0xff]  ;;  %vm915_vm4 = vweird.f32 %v2873_v59 }
 0x133   :  { %v911_v11 = vmul.f32 0.5, %v910_v55  ;;  %489 = vadd.xlane.f32.xlu2 %v488_v31  ;;  %486 = vadd.xlane.f32.xlu1 %v485_v37  ;;  %v325_v21 = vmul.f32 %v4578_v3, %v4578_v3  ;;  %v787_v55 = vmax.f32 %v723_v24, 0.0  ;;  %v324_v61 = vmul.f32 %v4579_v39, %v4579_v39  ;;  %v2928_v19 = vld [vmem:[%s4472_s1] ss:$0 sm:$0xff]  ;;  %vm916_vm8 = vmor %vm914_vm2, %vm915_vm4 }
 0x134   :  { %v922_v38 = vsub.f32 1.5, %v921_v7  ;;  %483 = vadd.xlane.f32.xlu0 %v482_v48  ;;  %vm954_vm5 = vweird.f32 %v2870_v43  ;;  %v786_v37 = vmax.f32 %v722_v13, 0.0  ;;  %v2921_v7 = vsel %vm75_vm0, %v326_v33, 0.0  ;;  %v1878_v39 = vld [vmem:[%s4471_s0] sm:$0xff] }
 0x135   :  { %v2909_v27 = vpop.eup %1753  ;;  %v912_v47 = vsub.f32 1.5, %v911_v11  ;;  %vm944_vm7 = vweird.f32 %v2877_v30  ;;  %v2938_v33 = vadd.f32 1e-05, %v787_v55  ;;  %vm934_vm9 = vweird.f32 %v2879_v49 }
 0x136   :  { %v2914_v14 = vpop.eup %1755  ;;  %v923_v26 = vmul.f32 %v2864_v22, %v922_v38  ;;  %v949_v31 = vmul.f32 %v2909_v27, %v2870_v43  ;;  %v364_v48 = vpop.xlane.xlu2 %363  ;;  %v785_v38 = vmax.f32 %v721_v6, 0.0  ;;  %v1877_v6 = vld [vmem:[%s4471_s0 + $0x8] sm:$0xff]  ;;  %vm955_vm10 = vweird.f32 %v2909_v27 }
 0x137   :  { %v2923_v11 = vpop.eup %1757  ;;  %v913_v24 = vmul.f32 %v2873_v59, %v912_v47  ;;  %v939_v13 = vmul.f32 %v2914_v14, %v2877_v30  ;;  %v2950_v47 = vsel %vm75_vm0, %v325_v21, 0.0  ;;  %1759 = vrsqrt.f32 %v2938_v33  ;;  %v361_v8 = vpop.xlane.xlu1 %360  ;;  %vm956_vm13 = vmor %vm954_vm5, %vm955_vm10 }
 0x138   :  { %v927_v18 = vsel %vm926_vm6, %v2864_v22, %v923_v26  ;;  %v950_v57 = vmul.f32 %v2909_v27, %v949_v31  ;;  %v929_v3 = vmul.f32 %v2923_v11, %v2879_v49  ;;  %vm945_vm11 = vweird.f32 %v2914_v14  ;;  %v1881_v49 = vld [vmem:[%s4471_s0 + $0x10] sm:$0xff] }
 0x139   :  { %v1550_v22 = vmul.f32 %v1877_v6, %v927_v18  ;;  %v917_v55 = vsel %vm916_vm8, %v2873_v59, %v913_v24  ;;  %v940_v23 = vmul.f32 %v2914_v14, %v939_v13  ;;  %v2964_v6 = vadd.f32 1e-05, %v786_v37  ;;  %vm946_vm14 = vmor %vm944_vm7, %vm945_vm11 }
 0x13a   :  { %v1549_v26 = vmul.f32 %v1878_v39, %v917_v55  ;;  %v951_v31 = vmul.f32 0.5, %v950_v57  ;;  %v930_v21 = vmul.f32 %v2923_v11, %v929_v3  ;;  %v2966_v59 = vadd.f32 1e-05, %v785_v38  ;;  %v358_v39 = vpop.xlane.xlu0 %357 }
 0x13b   :  { %v1617_v25 = vmul.f32 %v2928_v19, %v1550_v22  ;;  %v941_v18 = vmul.f32 0.5, %v940_v23  ;;  %498 = vadd.xlane.f32.xlu2 %v2887_v1  ;;  %495 = vadd.xlane.f32.xlu1 %v2892_v4  ;;  %v598_v55 = vmul.f32 0.03125, %v364_v48  ;;  %vm935_vm12 = vweird.f32 %v2923_v11 }
 0x13c   :  { %v1616_v24 = vmul.f32 %v2928_v19, %v1549_v26  ;;  %v952_v13 = vsub.f32 1.5, %v951_v31  ;;  %v931_v57 = vmul.f32 0.5, %v930_v21  ;;  %492 = vadd.xlane.f32.xlu0 %v2895_v32  ;;  %1761 = vrsqrt.f32 %v2964_v6  ;;  %vm936_vm15 = vmor %vm934_vm9, %vm935_vm12 }
 0x13d   :  { %1681 = vst.msk [vmem:[%s4473_s2 + $0x8] sm:$0xff] %vm75_vm0, %v1617_v25  ;;  %v942_v37 = vsub.f32 1.5, %v941_v18  ;;  %1763 = vrsqrt.f32 %v2966_v59  ;;  %v726_v32 = vsub.f32 %v598_v55, %v2663_v35  ;;  %v2986_v48 = vpop.eup %1759  ;;  %v597_v3 = vmul.f32 0.03125, %v361_v8  ;;  %v1879_v8 = vld [vmem:[%s4471_s0 + $0x20] sm:$0xff]  ;;  %v1880_v18 = vld [vmem:[%s4471_s0 + $0x18] sm:$0xff] }
 0x13e   :  { %1680 = vst.msk [vmem:[%s4473_s2] sm:$0xff] %vm75_vm0, %v1616_v24  ;;  %v953_v1 = vmul.f32 %v2909_v27, %v952_v13  ;;  %v932_v4 = vsub.f32 1.5, %v931_v57  ;;  %v373_v25 = vpop.xlane.xlu2 %372  ;;  %v596_v22 = vmul.f32 0.03125, %v358_v39  ;;  %v500_v23 = vsel %vm75_vm0, %v324_v61, 0.0 }
 0x13f   :  { %v943_v38 = vmul.f32 %v2914_v14, %v942_v37  ;;  %v979_v31 = vmul.f32 %v2986_v48, %v2938_v33  ;;  %v601_v43 = vmul.f32 0.03125, %v373_v25  ;;  %v725_v30 = vsub.f32 %v597_v3, %v2665_v40  ;;  %v370_v25 = vpop.xlane.xlu1 %369 }
 0x140   :  { %v957_v26 = vsel %vm956_vm13, %v2909_v27, %v953_v1  ;;  %v933_v35 = vmul.f32 %v2923_v11, %v932_v4  ;;  %v790_v27 = vmax.f32 %v726_v32, 0.0  ;;  %v724_v55 = vsub.f32 %v596_v22, %v2651_v28 }
 0x141   :  { %v1553_v21 = vmul.f32 %v1879_v8, %v957_v26  ;;  %v947_v61 = vsel %vm946_vm14, %v2914_v14, %v943_v38  ;;  %v980_v57 = vmul.f32 %v2986_v48, %v979_v31  ;;  %v789_v1 = vmax.f32 %v725_v30, 0.0 }
 0x142   :  { %v1552_v24 = vmul.f32 %v1880_v18, %v947_v61  ;;  %v937_v13 = vsel %vm936_vm15, %v2923_v11, %v933_v35  ;;  %v3017_v14 = vpop.eup %1761  ;;  %v3023_v37 = vadd.f32 1e-05, %v790_v27  ;;  %vm984_vm1 = vweird.f32 %v2938_v33  ;;  %v367_v8 = vpop.xlane.xlu0 %366  ;;  %v1882_v33 = vld [vmem:[%s4471_s0 + $0x38] sm:$0xff] }
 0x143   :  { %v1620_v39 = vmul.f32 %v2928_v19, %v1553_v21  ;;  %v1551_v40 = vmul.f32 %v1881_v49, %v937_v13  ;;  %507 = vadd.xlane.f32.xlu2 %v2921_v7  ;;  %504 = vadd.xlane.f32.xlu1 %v2950_v47  ;;  %v3027_v11 = vpop.eup %1763  ;;  %v981_v4 = vmul.f32 0.5, %v980_v57  ;;  %v969_v32 = vmul.f32 %v3017_v14, %v2964_v6 }
 0x144   :  { %v1619_v28 = vmul.f32 %v2928_v19, %v1552_v24  ;;  %501 = vadd.xlane.f32.xlu0 %v500_v23  ;;  %vm974_vm2 = vweird.f32 %v2964_v6  ;;  %v959_v47 = vmul.f32 %v3027_v11, %v2966_v59  ;;  %1765 = vrsqrt.f32 %v3023_v37 }
 0x145   :  { %1684 = vst.msk [vmem:[%s4473_s2 + $0x20] sm:$0xff] %vm75_vm0, %v1620_v39  ;;  %v1618_v7 = vmul.f32 %v2928_v19, %v1551_v40  ;;  %v982_v38 = vsub.f32 1.5, %v981_v4  ;;  %vm985_vm3 = vweird.f32 %v2986_v48  ;;  %v970_v3 = vmul.f32 %v3017_v14, %v969_v32 }
 0x146   :  { %1683 = vst.msk [vmem:[%s4473_s2 + $0x18] sm:$0xff] %vm75_vm0, %v1619_v28  ;;  %v3048_v22 = vadd.f32 1e-05, %v789_v1  ;;  %v960_v23 = vmul.f32 %v3027_v11, %v959_v47  ;;  %v788_v26 = vmax.f32 %v724_v55, 0.0  ;;  %v729_v35 = vsub.f32 %v601_v43, %v2673_v42  ;;  %vm986_vm5 = vmor %vm984_vm1, %vm985_vm3  ;;  %v382_v13 = vpop.xlane.xlu2 %381 }
 0x147   :  { %1682 = vst.msk [vmem:[%s4473_s2 + $0x10] sm:$0xff] %vm75_vm0, %v1618_v7  ;;  %v600_v31 = vmul.f32 0.03125, %v370_v25  ;;  %v983_v21 = vmul.f32 %v2986_v48, %v982_v38  ;;  %v971_v61 = vmul.f32 0.5, %v970_v3  ;;  %vm964_vm4 = vweird.f32 %v2966_v59  ;;  %v379_v6 = vpop.xlane.xlu1 %378 }
 0x148   :  { %1767 = vrsqrt.f32 %v3048_v22  ;;  %v961_v27 = vmul.f32 0.5, %v960_v23  ;;  %v3061_v30 = vadd.f32 1e-05, %v788_v26  ;;  %v793_v18 = vmax.f32 %v729_v35, 0.0  ;;  %v1884_v23 = vld [vmem:[%s4471_s0 + $0x28] sm:$0xff] }
 0x149   :  { %v728_v24 = vsub.f32 %v600_v31, %v2675_v5  ;;  %v987_v42 = vsel %vm986_vm5, %v2986_v48, %v983_v21  ;;  %v972_v43 = vsub.f32 1.5, %v971_v61  ;;  %vm975_vm6 = vweird.f32 %v3017_v14 }
 0x14a   :  { %v599_v57 = vmul.f32 0.03125, %v367_v8  ;;  %v3066_v55 = vpop.eup %1765  ;;  %v1556_v39 = vmul.f32 %v1882_v33, %v987_v42  ;;  %v962_v49 = vsub.f32 1.5, %v961_v27  ;;  %vm965_vm7 = vweird.f32 %v3027_v11  ;;  %vm976_vm8 = vmor %vm974_vm2, %vm975_vm6 }
 0x14b   :  { %1769 = vrsqrt.f32 %v3061_v30  ;;  %v973_v5 = vmul.f32 %v3017_v14, %v972_v43  ;;  %v1009_v48 = vmul.f32 %v3066_v55, %v3023_v37  ;;  %v3076_v40 = vadd.f32 1e-05, %v793_v18  ;;  %vm966_vm9 = vmor %vm964_vm4, %vm965_vm7 }
 0x14c   :  { %v604_v1 = vmul.f32 0.03125, %v382_v13  ;;  %v1623_v28 = vmul.f32 %v2928_v19, %v1556_v39  ;;  %v963_v4 = vmul.f32 %v3027_v11, %v962_v49  ;;  %v792_v32 = vmax.f32 %v728_v24, 0.0 }
 0x14d   :  { %v727_v25 = vsub.f32 %v599_v57, %v2660_v58  ;;  %v977_v47 = vsel %vm976_vm8, %v3017_v14, %v973_v5  ;;  %v1010_v38 = vmul.f32 %v3066_v55, %v1009_v48  ;;  %vm1014_vm10 = vweird.f32 %v3023_v37  ;;  %v1883_v58 = vld [vmem:[%s4471_s0 + $0x30] sm:$0xff] }
 0x14e   :  { %v3083_v7 = vpop.eup %1767  ;;  %1771 = vrsqrt.f32 %v3076_v40  ;;  %1687 = vst.msk [vmem:[%s4473_s2 + $0x38] sm:$0xff] %vm75_vm0, %v1623_v28  ;;  %v1555_v14 = vmul.f32 %v1883_v58, %v977_v47  ;;  %v967_v59 = vsel %vm966_vm9, %v3027_v11, %v963_v4  ;;  %vm1004_vm11 = vweird.f32 %v3048_v22  ;;  %v376_v28 = vpop.xlane.xlu0 %375 }
 0x14f   :  { %v999_v3 = vmul.f32 %v3083_v7, %v3048_v22  ;;  %v1554_v26 = vmul.f32 %v1884_v23, %v967_v59  ;;  %v1011_v35 = vmul.f32 0.5, %v1010_v38  ;;  %v3105_v31 = vadd.f32 1e-05, %v792_v32  ;;  %v3148_v58 = vpop.xlane.xlu2 %390  ;;  %v1886_v22 = vld [vmem:[%s4471_s0 + $0x48] sm:$0xff] }
 0x150   :  { %v791_v8 = vmax.f32 %v727_v25, 0.0  ;;  %v1622_v61 = vmul.f32 %v2928_v19, %v1555_v14  ;;  %v732_v27 = vsub.f32 %v604_v1, %v2681_v10  ;;  %v603_v18 = vmul.f32 0.03125, %v379_v6 }
 0x151   :  { %v3107_v21 = vpop.eup %1769  ;;  %v1000_v11 = vmul.f32 %v3083_v7, %v999_v3  ;;  %v1621_v24 = vmul.f32 %v2928_v19, %v1554_v26  ;;  %v1012_v13 = vsub.f32 1.5, %v1011_v35  ;;  %vm1015_vm12 = vweird.f32 %v3066_v55 }
 0x152   :  { %v989_v42 = vmul.f32 %v3107_v21, %v3061_v30  ;;  %1686 = vst.msk [vmem:[%s4473_s2 + $0x30] sm:$0xff] %vm75_vm0, %v1622_v61  ;;  %vm994_vm13 = vweird.f32 %v3061_v30  ;;  %1773 = vrsqrt.f32 %v3105_v31  ;;  %v3122_v10 = vadd.f32 1e-05, %v791_v8  ;;  %vm1016_vm14 = vmor %vm1014_vm10, %vm1015_vm12  ;;  %v1887_v30 = vld [vmem:[%s4471_s0 + $0x40] sm:$0xff] }
 0x153   :  { %v1001_v43 = vmul.f32 0.5, %v1000_v11  ;;  %1685 = vst.msk [vmem:[%s4473_s2 + $0x28] sm:$0xff] %vm75_vm0, %v1621_v24  ;;  %v1013_v33 = vmul.f32 %v3066_v55, %v1012_v13  ;;  %v796_v49 = vmax.f32 %v732_v27, 0.0  ;;  %v731_v5 = vsub.f32 %v603_v18, %v2683_v60  ;;  %v1885_v60 = vld [vmem:[%s4471_s0 + $0x50] sm:$0xff]  ;;  %v3167_v27 = vpop.xlane.xlu1 %387  ;;  %v4580_v24 = vld [vmem:[#allocation23_spill] sm:$0xff] }
 0x154   :  { %v3124_v57 = vpop.eup %1771  ;;  %v990_v39 = vmul.f32 %v3107_v21, %v989_v42  ;;  %vm1005_vm15 = vweird.f32 %v3083_v7  ;;  %1775 = vrsqrt.f32 %v3122_v10  ;;  %vm1044_vm1 = vweird.f32 %v3076_v40 }
 0x155   :  { %v1002_v48 = vsub.f32 1.5, %v1001_v43  ;;  %v1039_v1 = vmul.f32 %v3124_v57, %v3076_v40  ;;  %v1017_v4 = vsel %vm1016_vm14, %v3066_v55, %v1013_v33  ;;  %v3141_v25 = vadd.f32 1e-05, %v796_v49  ;;  %vm1006_vm2 = vmor %vm1004_vm11, %vm1005_vm15 }
 0x156   :  { %v991_v32 = vmul.f32 0.5, %v990_v39  ;;  %v1559_v37 = vmul.f32 %v1885_v60, %v1017_v4  ;;  %v795_v6 = vmax.f32 %v731_v5, 0.0  ;;  %vm995_vm3 = vweird.f32 %v3107_v21  ;;  %v1888_v4 = vld [vmem:[%s4471_s0 + $0x1e8] sm:$0xff]  ;;  %v1889_v60 = vld [vmem:[%s4471_s0 + $0x1e0] sm:$0xff] }
 0x157   :  { %v1003_v47 = vmul.f32 %v3083_v7, %v1002_v48  ;;  %v1040_v38 = vmul.f32 %v3124_v57, %v1039_v1  ;;  %1777 = vrsqrt.f32 %v3141_v25  ;;  %v602_v14 = vmul.f32 0.03125, %v376_v28  ;;  %vm996_vm5 = vmor %vm994_vm13, %vm995_vm3 }
 0x158   :  { %v992_v55 = vsub.f32 1.5, %v991_v32  ;;  %v3154_v59 = vpop.eup %1773  ;;  %v1626_v3 = vmul.f32 %v2928_v19, %v1559_v37  ;;  %v3158_v35 = vadd.f32 1e-05, %v795_v6  ;;  %vm1034_vm4 = vweird.f32 %v3105_v31  ;;  %v385_v6 = vpop.xlane.xlu0 %384 }
 0x159   :  { %v1007_v23 = vsel %vm1006_vm2, %v3083_v7, %v1003_v47  ;;  %v1041_v26 = vmul.f32 0.5, %v1040_v38  ;;  %v1029_v11 = vmul.f32 %v3154_v59, %v3105_v31  ;;  %vm1045_vm6 = vweird.f32 %v3124_v57 }
 0x15a   :  { %v1558_v8 = vmul.f32 %v1886_v22, %v1007_v23  ;;  %v993_v61 = vmul.f32 %v3107_v21, %v992_v55  ;;  %v3169_v18 = vpop.eup %1775  ;;  %1690 = vst.msk [vmem:[%s4473_s2 + $0x50] sm:$0xff] %vm75_vm0, %v1626_v3  ;;  %1779 = vrsqrt.f32 %v3158_v35  ;;  %v730_v13 = vsub.f32 %v602_v14, %v4580_v24  ;;  %vm1046_vm9 = vmor %vm1044_vm1, %vm1045_vm6  ;;  %v1890_v55 = vld [vmem:[%s4471_s0 + $0x68] sm:$0xff]  ;;  %v3233_v24 = vpop.xlane.xlu2 %399 }
 0x15b   :  { %v1042_v7 = vsub.f32 1.5, %v1041_v26  ;;  %v1030_v33 = vmul.f32 %v3154_v59, %v1029_v11  ;;  %v1019_v39 = vmul.f32 %v3169_v18, %v3122_v10  ;;  %vm1024_vm7 = vweird.f32 %v3122_v10  ;;  %v1891_v11 = vld [vmem:[%s4471_s0 + $0x1d8] sm:$0xff] }
 0x15c   :  { %v1625_v42 = vmul.f32 %v2928_v19, %v1558_v8  ;;  %v997_v43 = vsel %vm996_vm5, %v3107_v21, %v993_v61  ;;  %vm1035_vm8 = vweird.f32 %v3154_v59  ;;  %v794_v48 = vmax.f32 %v730_v13, 0.0  ;;  %v1894_v10 = vld [vmem:[%s4471_s0 + $0x58] sm:$0xff] }
 0x15d   :  { %v1557_v49 = vmul.f32 %v1887_v30, %v997_v43  ;;  %v1043_v5 = vmul.f32 %v3124_v57, %v1042_v7  ;;  %v3193_v1 = vpop.eup %1777  ;;  %v1031_v21 = vmul.f32 0.5, %v1030_v33  ;;  %v1020_v28 = vmul.f32 %v3169_v18, %v1019_v39  ;;  %vm1036_vm12 = vmor %vm1034_vm4, %vm1035_vm8 }
 0x15e   :  { %1689 = vst.msk [vmem:[%s4473_s2 + $0x48] sm:$0xff] %vm75_vm0, %v1625_v42  ;;  %v329_v32 = vmul.f32 %v1888_v4, %v1888_v4  ;;  %v328_v37 = vmul.f32 %v1889_v60, %v1889_v60  ;;  %vm1025_vm10 = vweird.f32 %v3169_v18  ;;  %v1069_v40 = vmul.f32 %v3193_v1, %v3141_v25 }
 0x15f   :  { %v1624_v47 = vmul.f32 %v2928_v19, %v1557_v49  ;;  %v1047_v38 = vsel %vm1046_vm9, %v3124_v57, %v1043_v5  ;;  %vm1074_vm11 = vweird.f32 %v3141_v25  ;;  %v1032_v3 = vsub.f32 1.5, %v1031_v21  ;;  %v1892_v21 = vld [vmem:[%s4471_s0 + $0x60] sm:$0xff]  ;;  %vm1026_vm15 = vmor %vm1024_vm7, %vm1025_vm10 }
 0x160   :  { %v1562_v14 = vmul.f32 %v1890_v55, %v1047_v38  ;;  %v1021_v23 = vmul.f32 0.5, %v1020_v28  ;;  %v3219_v26 = vadd.f32 1e-05, %v794_v48  ;;  %v3221_v22 = vpop.eup %1779  ;;  %v1070_v57 = vmul.f32 %v3193_v1, %v1069_v40  ;;  %v397_v48 = vpop.xlane.xlu1 %396  ;;  %v1893_v38 = vld [vmem:[%s4471_s0 + $0x1f8] sm:$0xff] }
 0x161   :  { %1688 = vst.msk [vmem:[%s4473_s2 + $0x40] sm:$0xff] %vm75_vm0, %v1624_v47  ;;  %v515_v8 = vsel %vm75_vm0, %v329_v32, 0.0  ;;  %v512_v61 = vsel %vm75_vm0, %v328_v37, 0.0  ;;  %v327_v7 = vmul.f32 %v1891_v11, %v1891_v11  ;;  %v1033_v42 = vmul.f32 %v3154_v59, %v1032_v3  ;;  %v1896_v11 = vld [vmem:[%s4471_s0 + $0x80] sm:$0xff] }
 0x162   :  { %v1629_v13 = vmul.f32 %v2928_v19, %v1562_v14  ;;  %v1022_v43 = vsub.f32 1.5, %v1021_v23  ;;  %v1059_v33 = vmul.f32 %v3221_v22, %v3158_v35  ;;  %516 = vadd.xlane.f32.xlu2 %v515_v8  ;;  %513 = vadd.xlane.f32.xlu1 %v512_v61  ;;  %v1071_v39 = vmul.f32 0.5, %v1070_v57 }
 0x163   :  { %vm1075_vm13 = vweird.f32 %v3193_v1  ;;  %vm1065_vm14 = vweird.f32 %v3221_v22  ;;  %1781 = vrsqrt.f32 %v3219_v26  ;;  %v1037_v30 = vsel %vm1036_vm12, %v3154_v59, %v1033_v42 }
 0x164   :  { %1693 = vst.msk [vmem:[%s4473_s2 + $0x68] sm:$0xff] %vm75_vm0, %v1629_v13  ;;  %v1023_v49 = vmul.f32 %v3169_v18, %v1022_v43  ;;  %v1060_v5 = vmul.f32 %v3221_v22, %v1059_v33  ;;  %v509_v31 = vsel %vm75_vm0, %v327_v7, 0.0  ;;  %v1561_v28 = vmul.f32 %v1892_v21, %v1037_v30  ;;  %vm1076_vm1 = vmor %vm1074_vm11, %vm1075_vm13  ;;  %v409_v30 = vpop.xlane.xlu2 %408 }
 0x165   :  { %v1072_v4 = vsub.f32 1.5, %v1071_v39  ;;  %510 = vadd.xlane.f32.xlu0 %v509_v31  ;;  %v607_v59 = vmul.f32 0.03125, %v3148_v58  ;;  %v606_v32 = vmul.f32 0.03125, %v3167_v27  ;;  %v605_v47 = vmul.f32 0.03125, %v385_v6 }
 0x166   :  { %v1027_v60 = vsel %vm1026_vm15, %v3169_v18, %v1023_v49  ;;  %v1061_v37 = vmul.f32 0.5, %v1060_v5  ;;  %v331_v40 = vmul.f32 %v1893_v38, %v1893_v38  ;;  %v1628_v55 = vmul.f32 %v2928_v19, %v1561_v28  ;;  %v1897_v28 = vld [vmem:[%s4471_s0 + $0x78] sm:$0xff] }
 0x167   :  { %v1560_v14 = vmul.f32 %v1894_v10, %v1027_v60  ;;  %v1073_v58 = vmul.f32 %v3193_v1, %v1072_v4  ;;  %v735_v27 = vsub.f32 %v607_v59, %v2705_v36  ;;  %v734_v6 = vsub.f32 %v606_v32, %v2710_v9  ;;  %v1895_v9 = vld [vmem:[%s4471_s0 + $0x1f0] sm:$0xff] }
 0x168   :  { %v1062_v18 = vsub.f32 1.5, %v1061_v37  ;;  %v733_v3 = vsub.f32 %v605_v47, %v2679_v50  ;;  %v521_v23 = vsel %vm75_vm0, %v331_v40, 0.0  ;;  %1692 = vst.msk [vmem:[%s4473_s2 + $0x60] sm:$0xff] %vm75_vm0, %v1628_v55  ;;  %v330_v61 = vmul.f32 %v1895_v9, %v1895_v9  ;;  %v394_v50 = vpop.xlane.xlu0 %393  ;;  %v406_v60 = vpop.xlane.xlu1 %405  ;;  %v4581_v37 = vld [vmem:[#allocation24_spill] sm:$0xff] }
 0x169   :  { %v3280_v57 = vpop.eup %1781  ;;  %v1627_v36 = vmul.f32 %v2928_v19, %v1560_v14  ;;  %v1077_v8 = vsel %vm1076_vm1, %v3193_v1, %v1073_v58  ;;  %v799_v25 = vmax.f32 %v735_v27, 0.0  ;;  %vm1064_vm2 = vweird.f32 %v3158_v35 }
 0x16a   :  { %v1565_v7 = vmul.f32 %v1896_v11, %v1077_v8  ;;  %v1063_v13 = vmul.f32 %v3221_v22, %v1062_v18  ;;  %v1049_v42 = vmul.f32 %v3280_v57, %v3219_v26  ;;  %522 = vadd.xlane.f32.xlu1 %v521_v23  ;;  %vm1066_vm3 = vmor %vm1064_vm2, %vm1065_vm14  ;;  %v798_v43 = vmax.f32 %v734_v6, 0.0  ;;  %v4583_v18 = vld [vmem:[#allocation4_spill] sm:$0xff]  ;;  %v4584_v8 = vld [vmem:[#allocation2_spill] sm:$0xff] }
 0x16b   :  { %1691 = vst.msk [vmem:[%s4473_s2 + $0x58] sm:$0xff] %vm75_vm0, %v1627_v36  ;;  %v3304_v1 = vadd.f32 1e-05, %v799_v25  ;;  %v797_v33 = vmax.f32 %v733_v3, 0.0  ;;  %v518_v39 = vsel %vm75_vm0, %v330_v61, 0.0  ;;  %v610_v31 = vmul.f32 0.03125, %v3233_v24 }
 0x16c   :  { %v1632_v35 = vmul.f32 %v2928_v19, %v1565_v7  ;;  %v1067_v49 = vsel %vm1066_vm3, %v3221_v22, %v1063_v13  ;;  %v1050_v5 = vmul.f32 %v3280_v57, %v1049_v42  ;;  %v3313_v21 = vmul.f32 %v2854_v44, %v2854_v44  ;;  %v1898_v13 = vld [vmem:[%s4471_s0 + $0x70] sm:$0xff] }
 0x16d   :  { %v1564_v4 = vmul.f32 %v1897_v28, %v1067_v49  ;;  %1783 = vrsqrt.f32 %v3304_v1  ;;  %v3319_v59 = vadd.f32 1e-05, %v798_v43  ;;  %519 = vadd.xlane.f32.xlu0 %v518_v39  ;;  %v3325_v24 = vadd.f32 1e-05, %v797_v33  ;;  %v418_v33 = vpop.xlane.xlu2 %417 }
 0x16e   :  { %1696 = vst.msk [vmem:[%s4473_s2 + $0x80] sm:$0xff] %vm75_vm0, %v1632_v35  ;;  %v1051_v22 = vmul.f32 0.5, %v1050_v5  ;;  %v738_v44 = vsub.f32 %v610_v31, %v2714_v51  ;;  %v609_v32 = vmul.f32 0.03125, %v397_v48  ;;  %v3329_v47 = vmul.f32 0.03125, %v4581_v37  ;;  %v4582_v48 = vld [vmem:[#allocation5_spill] sm:$0xff] }
 0x16f   :  { %v1631_v38 = vmul.f32 %v2928_v19, %v1564_v4  ;;  %1785 = vrsqrt.f32 %v3319_v59  ;;  %v608_v40 = vmul.f32 0.03125, %v394_v50  ;;  %vm1055_vm4 = vweird.f32 %v3280_v57 }
 0x170   :  { %v1052_v55 = vsub.f32 1.5, %v1051_v22  ;;  %1787 = vrsqrt.f32 %v3325_v24  ;;  %v802_v10 = vmax.f32 %v738_v44, 0.0  ;;  %v737_v51 = vsub.f32 %v609_v32, %v2717_v2  ;;  %v403_v50 = vpop.xlane.xlu0 %402 }
 0x171   :  { %1695 = vst.msk [vmem:[%s4473_s2 + $0x78] sm:$0xff] %vm75_vm0, %v1631_v38  ;;  %v736_v14 = vsub.f32 %v608_v40, %v4582_v48  ;;  %v613_v58 = vmul.f32 0.03125, %v409_v30  ;;  %v612_v27 = vmul.f32 0.03125, %v406_v60  ;;  %v3342_v6 = vmul.f32 0.03125, %v4583_v18 }
 0x172   :  { %v1053_v3 = vmul.f32 %v3280_v57, %v1052_v55  ;;  %vm1054_vm5 = vweird.f32 %v3219_v26  ;;  %v3346_v23 = vadd.f32 1e-05, %v802_v10  ;;  %v3351_v25 = vmul.f32 0.03125, %v4584_v8 }
 0x173   :  { %v3348_v36 = vpop.eup %1783  ;;  %vm1056_vm6 = vmor %vm1054_vm5, %vm1055_vm4  ;;  %v801_v2 = vmax.f32 %v737_v51, 0.0  ;;  %v800_v9 = vmax.f32 %v736_v14, 0.0  ;;  %v741_v61 = vsub.f32 %v613_v58, %v2725_v52  ;;  %vm1104_vm7 = vweird.f32 %v3304_v1 }
 0x174   :  { %v1057_v11 = vsel %vm1056_vm6, %v3280_v57, %v1053_v3  ;;  %v1099_v7 = vmul.f32 %v3348_v36, %v3304_v1  ;;  %1789 = vrsqrt.f32 %v3346_v23  ;;  %v740_v57 = vsub.f32 %v612_v27, %v2727_v56 }
 0x175   :  { %v3359_v26 = vpop.eup %1785  ;;  %v1563_v42 = vmul.f32 %v1898_v13, %v1057_v11  ;;  %v3364_v43 = vadd.f32 1e-05, %v801_v2  ;;  %v3366_v52 = vadd.f32 1e-05, %v800_v9  ;;  %v805_v49 = vmax.f32 %v741_v61, 0.0  ;;  %v1899_v61 = vld [vmem:[%s4471_s0 + $0x98] sm:$0xff]  ;;  %v415_v13 = vpop.xlane.xlu1 %414 }
 0x176   :  { %v3369_v39 = vpop.eup %1787  ;;  %v1100_v30 = vmul.f32 %v3348_v36, %v1099_v7  ;;  %v1089_v35 = vmul.f32 %v3359_v26, %v3319_v59  ;;  %v611_v5 = vmul.f32 0.03125, %v403_v50  ;;  %vm1094_vm8 = vweird.f32 %v3319_v59 }
 0x177   :  { %v1630_v31 = vmul.f32 %v2928_v19, %v1563_v42  ;;  %v1079_v28 = vmul.f32 %v3369_v39, %v3325_v24  ;;  %1791 = vrsqrt.f32 %v3364_v43  ;;  %v616_v22 = vmul.f32 0.03125, %v418_v33 }
 0x178   :  { %v1101_v56 = vmul.f32 0.5, %v1100_v30  ;;  %v1090_v4 = vmul.f32 %v3359_v26, %v1089_v35  ;;  %1793 = vrsqrt.f32 %v3366_v52  ;;  %vm1084_vm9 = vweird.f32 %v3325_v24 }
 0x179   :  { %1694 = vst.msk [vmem:[%s4473_s2 + $0x70] sm:$0xff] %vm75_vm0, %v1630_v31  ;;  %v1080_v44 = vmul.f32 %v3369_v39, %v1079_v28  ;;  %v3387_v32 = vadd.f32 1e-05, %v805_v49  ;;  %v804_v60 = vmax.f32 %v740_v57, 0.0  ;;  %vm1105_vm10 = vweird.f32 %v3348_v36  ;;  %v1901_v31 = vld [vmem:[%s4471_s0 + $0x88] sm:$0xff] }
 0x17a   :  { %v3389_v37 = vpop.eup %1789  ;;  %v1102_v38 = vsub.f32 1.5, %v1101_v56  ;;  %v1091_v40 = vmul.f32 0.5, %v1090_v4  ;;  %v739_v55 = vsub.f32 %v611_v5, %v2712_v54  ;;  %vm1095_vm11 = vweird.f32 %v3359_v26  ;;  %vm1106_vm13 = vmor %vm1104_vm7, %vm1105_vm10  ;;  %v412_v5 = vpop.xlane.xlu0 %411 }
 0x17b   :  { %v1081_v10 = vmul.f32 0.5, %v1080_v44  ;;  %v1129_v51 = vmul.f32 %v3389_v37, %v3346_v23  ;;  %vm1134_vm12 = vweird.f32 %v3346_v23  ;;  %1795 = vrsqrt.f32 %v3387_v32  ;;  %vm1096_vm2 = vmor %vm1094_vm8, %vm1095_vm11  ;;  %v427_v44 = vpop.xlane.xlu2 %426  ;;  %v1902_v23 = vld [vmem:[%s4471_s0 + $0xb0] sm:$0xff] }
 0x17c   :  { %v1103_v48 = vmul.f32 %v3348_v36, %v1102_v38  ;;  %v1092_v14 = vsub.f32 1.5, %v1091_v40  ;;  %v3399_v58 = vadd.f32 1e-05, %v804_v60  ;;  %v744_v27 = vsub.f32 %v616_v22, %v2733_v63 }
 0x17d   :  { %v3402_v18 = vpop.eup %1791  ;;  %v1082_v54 = vsub.f32 1.5, %v1081_v10  ;;  %vm1085_vm14 = vweird.f32 %v3369_v39  ;;  %v1130_v3 = vmul.f32 %v3389_v37, %v1129_v51  ;;  %vm1135_vm15 = vweird.f32 %v3389_v37 }
 0x17e   :  { %v3409_v8 = vpop.eup %1793  ;;  %v1107_v2 = vsel %vm1106_vm13, %v3348_v36, %v1103_v48  ;;  %v1093_v9 = vmul.f32 %v3359_v26, %v1092_v14  ;;  %v1119_v63 = vmul.f32 %v3402_v18, %v3364_v43  ;;  %vm1124_vm1 = vweird.f32 %v3364_v43  ;;  %vm1086_vm3 = vmor %vm1084_vm9, %vm1085_vm14  ;;  %v1903_v43 = vld [vmem:[%s4471_s0 + $0xa8] sm:$0xff] }
 0x17f   :  { %v803_v1 = vmax.f32 %v739_v55, 0.0  ;;  %v1568_v50 = vmul.f32 %v1899_v61, %v1107_v2  ;;  %v1083_v36 = vmul.f32 %v3369_v39, %v1082_v54  ;;  %v1131_v11 = vmul.f32 0.5, %v1130_v3  ;;  %vm1136_vm7 = vmor %vm1134_vm12, %vm1135_vm15 }
 0x180   :  { %v1109_v7 = vmul.f32 %v3409_v8, %v3366_v52  ;;  %v1097_v42 = vsel %vm1096_vm2, %v3359_v26, %v1093_v9  ;;  %v1120_v57 = vmul.f32 %v3402_v18, %v1119_v63  ;;  %vm1114_vm4 = vweird.f32 %v3366_v52  ;;  %v1900_v26 = vld [vmem:[%s4471_s0 + $0x90] sm:$0xff] }
 0x181   :  { %1797 = vrsqrt.f32 %v3399_v58  ;;  %v808_v59 = vmax.f32 %v744_v27, 0.0  ;;  %v3434_v33 = vpop.eup %1795  ;;  %v1635_v30 = vmul.f32 %v2928_v19, %v1568_v50  ;;  %v1567_v35 = vmul.f32 %v1900_v26, %v1097_v42 }
 0x182   :  { %v1087_v49 = vsel %vm1086_vm3, %v3369_v39, %v1083_v36  ;;  %v1132_v24 = vsub.f32 1.5, %v1131_v11  ;;  %v1121_v56 = vmul.f32 0.5, %v1120_v57  ;;  %v1110_v4 = vmul.f32 %v3409_v8, %v1109_v7 }
 0x183   :  { %v1566_v28 = vmul.f32 %v1901_v31, %v1087_v49  ;;  %v1159_v22 = vmul.f32 %v3434_v33, %v3387_v32  ;;  %1699 = vst.msk [vmem:[%s4473_s2 + $0x98] sm:$0xff] %vm75_vm0, %v1635_v30  ;;  %v1634_v39 = vmul.f32 %v2928_v19, %v1567_v35  ;;  %vm1125_vm5 = vweird.f32 %v3402_v18  ;;  %v1904_v30 = vld [vmem:[%s4471_s0 + $0xa0] sm:$0xff] }
 0x184   :  { %v1133_v60 = vmul.f32 %v3389_v37, %v1132_v24  ;;  %vm1115_vm6 = vweird.f32 %v3409_v8  ;;  %v1122_v40 = vsub.f32 1.5, %v1121_v56  ;;  %v1111_v55 = vmul.f32 0.5, %v1110_v4  ;;  %vm1126_vm8 = vmor %vm1124_vm1, %vm1125_vm5  ;;  %v1905_v4 = vld [vmem:[%s4471_s0 + $0xc8] sm:$0xff] }
 0x185   :  { %v1633_v38 = vmul.f32 %v2928_v19, %v1566_v28  ;;  %v1160_v10 = vmul.f32 %v3434_v33, %v1159_v22  ;;  %1698 = vst.msk [vmem:[%s4473_s2 + $0x90] sm:$0xff] %vm75_vm0, %v1634_v39  ;;  %v3466_v48 = vadd.f32 1e-05, %v803_v1  ;;  %v3468_v14 = vadd.f32 1e-05, %v808_v59  ;;  %vm1116_vm11 = vmor %vm1114_vm4, %vm1115_vm6  ;;  %v436_v28 = vpop.xlane.xlu2 %435 }
 0x186   :  { %v1137_v51 = vsel %vm1136_vm7, %v3389_v37, %v1133_v60  ;;  %v615_v27 = vmul.f32 0.03125, %v415_v13  ;;  %v1123_v2 = vmul.f32 %v3402_v18, %v1122_v40  ;;  %v1112_v37 = vsub.f32 1.5, %v1111_v55 }
 0x187   :  { %v3470_v54 = vpop.eup %1797  ;;  %1697 = vst.msk [vmem:[%s4473_s2 + $0x88] sm:$0xff] %vm75_vm0, %v1633_v38  ;;  %v1571_v3 = vmul.f32 %v1902_v23, %v1137_v51  ;;  %v1161_v9 = vmul.f32 0.5, %v1160_v10  ;;  %vm1164_vm9 = vweird.f32 %v3387_v32  ;;  %vm1165_vm10 = vweird.f32 %v3434_v33 }
 0x188   :  { %v1149_v63 = vmul.f32 %v3470_v54, %v3399_v58  ;;  %1799 = vrsqrt.f32 %v3466_v48  ;;  %v1127_v61 = vsel %vm1126_vm8, %v3402_v18, %v1123_v2  ;;  %v1113_v50 = vmul.f32 %v3409_v8, %v1112_v37  ;;  %v424_v18 = vpop.xlane.xlu1 %423  ;;  %vm1166_vm13 = vmor %vm1164_vm9, %vm1165_vm10  ;;  %v1906_v2 = vld [vmem:[%s4471_s0 + $0xc0] sm:$0xff] }
 0x189   :  { %v1638_v1 = vmul.f32 %v2928_v19, %v1571_v3  ;;  %v1162_v36 = vsub.f32 1.5, %v1161_v9  ;;  %v1570_v11 = vmul.f32 %v1903_v43, %v1127_v61  ;;  %vm1155_vm12 = vweird.f32 %v3470_v54 }
 0x18a   :  { %v1150_v7 = vmul.f32 %v3470_v54, %v1149_v63  ;;  %1801 = vrsqrt.f32 %v3468_v14  ;;  %v1117_v13 = vsel %vm1116_vm11, %v3409_v8, %v1113_v50  ;;  %v743_v57 = vsub.f32 %v615_v27, %v2735_v41  ;;  %v421_v8 = vpop.xlane.xlu0 %420 }
 0x18b   :  { %1702 = vst.msk [vmem:[%s4473_s2 + $0xb0] sm:$0xff] %vm75_vm0, %v1638_v1  ;;  %v1163_v42 = vmul.f32 %v3434_v33, %v1162_v36  ;;  %v614_v52 = vmul.f32 0.03125, %v412_v5  ;;  %v1637_v59 = vmul.f32 %v2928_v19, %v1570_v11  ;;  %v1569_v26 = vmul.f32 %v1904_v30, %v1117_v13 }
 0x18c   :  { %v1151_v35 = vmul.f32 0.5, %v1150_v7  ;;  %v619_v49 = vmul.f32 0.03125, %v427_v44  ;;  %v807_v31 = vmax.f32 %v743_v57, 0.0  ;;  %v618_v5 = vmul.f32 0.03125, %v424_v18 }
 0x18d   :  { %v1167_v24 = vsel %vm1166_vm13, %v3434_v33, %v1163_v42  ;;  %v742_v41 = vsub.f32 %v614_v52, %v2719_v46  ;;  %1701 = vst.msk [vmem:[%s4473_s2 + $0xa8] sm:$0xff] %vm75_vm0, %v1637_v59  ;;  %v1636_v32 = vmul.f32 %v2928_v19, %v1569_v26  ;;  %vm1154_vm14 = vweird.f32 %v3399_v58 }
 0x18e   :  { %v3519_v56 = vpop.eup %1799  ;;  %v1574_v22 = vmul.f32 %v1905_v4, %v1167_v24  ;;  %v1152_v33 = vsub.f32 1.5, %v1151_v35  ;;  %v747_v44 = vsub.f32 %v619_v49, %v2744_v62  ;;  %v3533_v39 = vadd.f32 1e-05, %v807_v31  ;;  %vm1156_vm15 = vmor %vm1154_vm14, %vm1155_vm12  ;;  %v1907_v49 = vld [vmem:[%s4471_s0 + $0xb8] sm:$0xff]  ;;  %v3623_v4 = vld [vmem:[%s4472_s1] ss:$0 sm:$0xff] }
 0x18f   :  { %v1139_v46 = vmul.f32 %v3519_v56, %v3466_v48  ;;  %v806_v60 = vmax.f32 %v742_v41, 0.0  ;;  %1700 = vst.msk [vmem:[%s4473_s2 + $0xa0] sm:$0xff] %vm75_vm0, %v1636_v32  ;;  %v746_v58 = vsub.f32 %v618_v5, %v2759_v17  ;;  %v3546_v10 = vmul.f32 %v3329_v47, %v3329_v47 }
 0x190   :  { %v3535_v38 = vpop.eup %1801  ;;  %v1641_v40 = vmul.f32 %v2928_v19, %v1574_v22  ;;  %v1153_v55 = vmul.f32 %v3470_v54, %v1152_v33  ;;  %v811_v62 = vmax.f32 %v747_v44, 0.0  ;;  %1803 = vrsqrt.f32 %v3533_v39  ;;  %v433_v61 = vpop.xlane.xlu1 %432  ;;  %v1909_v22 = vld [vmem:[%s4471_s0 + $0xe0] sm:$0xff] }
 0x191   :  { %v1140_v51 = vmul.f32 %v3519_v56, %v1139_v46  ;;  %v1189_v27 = vmul.f32 %v3535_v38, %v3468_v14  ;;  %v3556_v23 = vmul.f32 %v3342_v6, %v3342_v6  ;;  %v3563_v47 = vadd.f32 1e-05, %v806_v60 }
 0x192   :  { %1705 = vst.msk [vmem:[%s4473_s2 + $0xc8] sm:$0xff] %vm75_vm0, %v1641_v40  ;;  %v1157_v17 = vsel %vm1156_vm15, %v3470_v54, %v1153_v55  ;;  %v3565_v3 = vadd.f32 1e-05, %v811_v62  ;;  %v810_v63 = vmax.f32 %v746_v58, 0.0  ;;  %v3573_v1 = vmul.f32 %v3351_v25, %v3351_v25  ;;  %v430_v18 = vpop.xlane.xlu0 %429 }
 0x193   :  { %v1573_v37 = vmul.f32 %v1906_v2, %v1157_v17  ;;  %v1141_v9 = vmul.f32 0.5, %v1140_v51  ;;  %v1190_v6 = vmul.f32 %v3535_v38, %v1189_v27  ;;  %vm1145_vm1 = vweird.f32 %v3519_v56 }
 0x194   :  { %1805 = vrsqrt.f32 %v3563_v47  ;;  %v617_v54 = vmul.f32 0.03125, %v421_v8  ;;  %vm1144_vm2 = vweird.f32 %v3466_v48  ;;  %v3580_v11 = vadd.f32 1e-05, %v810_v63  ;;  %v445_v48 = vpop.xlane.xlu2 %444 }
 0x195   :  { %v1640_v50 = vmul.f32 %v2928_v19, %v1573_v37  ;;  %v1142_v36 = vsub.f32 1.5, %v1141_v9  ;;  %v1191_v43 = vmul.f32 0.5, %v1190_v6  ;;  %1807 = vrsqrt.f32 %v3565_v3  ;;  %vm1146_vm4 = vmor %vm1144_vm2, %vm1145_vm1 }
 0x196   :  { %v745_v7 = vsub.f32 %v617_v54, %v2729_v15  ;;  %v622_v25 = vmul.f32 0.03125, %v436_v28  ;;  %v3583_v13 = vpop.eup %1803  ;;  %vm1195_vm3 = vweird.f32 %v3535_v38  ;;  %v621_v57 = vmul.f32 0.03125, %v433_v61 }
 0x197   :  { %1704 = vst.msk [vmem:[%s4473_s2 + $0xc0] sm:$0xff] %vm75_vm0, %v1640_v50  ;;  %v1143_v19 = vmul.f32 %v3519_v56, %v1142_v36  ;;  %v1192_v42 = vsub.f32 1.5, %v1191_v43  ;;  %vm1194_vm5 = vweird.f32 %v3468_v14  ;;  %v1179_v15 = vmul.f32 %v3583_v13, %v3533_v39 }
 0x198   :  { %vm1184_vm6 = vweird.f32 %v3533_v39  ;;  %1809 = vrsqrt.f32 %v3580_v11  ;;  %v809_v30 = vmax.f32 %v745_v7, 0.0  ;;  %v620_v26 = vmul.f32 0.03125, %v430_v18  ;;  %vm1196_vm7 = vmor %vm1194_vm5, %vm1195_vm3  ;;  %v442_v9 = vpop.xlane.xlu1 %441  ;;  %v1910_v39 = vld [vmem:[%s4471_s0 + $0xd8] sm:$0xff] }
 0x199   :  { %v1147_v52 = vsel %vm1146_vm4, %v3519_v56, %v1143_v19  ;;  %v1193_v59 = vmul.f32 %v3535_v38, %v1192_v42  ;;  %v1180_v8 = vmul.f32 %v3583_v13, %v1179_v15  ;;  %v750_v24 = vsub.f32 %v622_v25, %v2766_v0 }
 0x19a   :  { %v3600_v35 = vpop.eup %1805  ;;  %v1572_v14 = vmul.f32 %v1907_v49, %v1147_v52  ;;  %v3609_v31 = vmul.f32 0.03125, %v445_v48  ;;  %vm1174_vm8 = vweird.f32 %v3563_v47  ;;  %v3617_v56 = vadd.f32 1e-05, %v809_v30  ;;  %v439_v42 = vpop.xlane.xlu0 %438  ;;  %v1911_v52 = vld [vmem:[%s4471_s0 + $0xd0] sm:$0xff] }
 0x19b   :  { %v3611_v41 = vpop.eup %1807  ;;  %v1197_v5 = vsel %vm1196_vm7, %v3535_v38, %v1193_v59  ;;  %v1169_v28 = vmul.f32 %v3600_v35, %v3563_v47  ;;  %v749_v32 = vsub.f32 %v621_v57, %v2768_v16  ;;  %v1181_v44 = vmul.f32 0.5, %v1180_v8 }
 0x19c   :  { %v1639_v0 = vmul.f32 %v3623_v4, %v1572_v14  ;;  %v1577_v33 = vmul.f32 %v1909_v22, %v1197_v5  ;;  %v1219_v46 = vmul.f32 %v3611_v41, %v3565_v3  ;;  %vm1224_vm9 = vweird.f32 %v3565_v3  ;;  %v1912_v3 = vld [vmem:[%s4471_s0 + $0xf8] sm:$0xff] }
 0x19d   :  { %vm1185_vm10 = vweird.f32 %v3583_v13  ;;  %v1170_v16 = vmul.f32 %v3600_v35, %v1169_v28  ;;  %1811 = vrsqrt.f32 %v3617_v56  ;;  %v748_v60 = vsub.f32 %v620_v26, %v2737_v53 }
 0x19e   :  { %v3636_v38 = vpop.eup %1809  ;;  %1703 = vst.msk [vmem:[%s4473_s2 + $0xb8] sm:$0xff] %vm75_vm0, %v1639_v0  ;;  %v1644_v40 = vmul.f32 %v3623_v4, %v1577_v33  ;;  %v1182_v55 = vsub.f32 1.5, %v1181_v44  ;;  %v1220_v62 = vmul.f32 %v3611_v41, %v1219_v46  ;;  %v814_v58 = vmax.f32 %v750_v24, 0.0  ;;  %vm1186_vm13 = vmor %vm1184_vm6, %vm1185_vm10 }
 0x19f   :  { %v1171_v51 = vmul.f32 0.5, %v1170_v16  ;;  %vm1175_vm11 = vweird.f32 %v3600_v35  ;;  %v1209_v27 = vmul.f32 %v3636_v38, %v3580_v11  ;;  %v813_v53 = vmax.f32 %v749_v32, 0.0  ;;  %v454_v16 = vpop.xlane.xlu2 %453 }
 0x1a0   :  { %1708 = vst.msk [vmem:[%s4473_s2 + $0xe0] sm:$0xff] %vm75_vm0, %v1644_v40  ;;  %v1183_v17 = vmul.f32 %v3583_v13, %v1182_v55  ;;  %v1221_v2 = vmul.f32 0.5, %v1220_v62  ;;  %vm1225_vm12 = vweird.f32 %v3611_v41  ;;  %v3653_v37 = vadd.f32 1e-05, %v814_v58  ;;  %vm1176_vm14 = vmor %vm1174_vm8, %vm1175_vm11 }
 0x1a1   :  { %v1172_v6 = vsub.f32 1.5, %v1171_v51  ;;  %v1210_v63 = vmul.f32 %v3636_v38, %v1209_v27  ;;  %v3660_v54 = vadd.f32 1e-05, %v813_v53  ;;  %v812_v61 = vmax.f32 %v748_v60, 0.0  ;;  %vm1226_vm2 = vmor %vm1224_vm9, %vm1225_vm12  ;;  %v451_v60 = vpop.xlane.xlu1 %450 }
 0x1a2   :  { %v1187_v50 = vsel %vm1186_vm13, %v3583_v13, %v1183_v17  ;;  %v1222_v36 = vsub.f32 1.5, %v1221_v2  ;;  %1813 = vrsqrt.f32 %v3653_v37  ;;  %v753_v43 = vsub.f32 %v3609_v31, %v2772_v20 }
 0x1a3   :  { %v3666_v7 = vpop.eup %1811  ;;  %v1576_v25 = vmul.f32 %v1910_v39, %v1187_v50  ;;  %v1173_v18 = vmul.f32 %v3600_v35, %v1172_v6  ;;  %v1211_v19 = vmul.f32 0.5, %v1210_v63  ;;  %1815 = vrsqrt.f32 %v3660_v54 }
 0x1a4   :  { %v1223_v13 = vmul.f32 %v3611_v41, %v1222_v36  ;;  %vm1214_vm15 = vweird.f32 %v3580_v11  ;;  %vm1215_vm1 = vweird.f32 %v3636_v38  ;;  %v1199_v20 = vmul.f32 %v3666_v7, %v3617_v56  ;;  %v1913_v11 = vld [vmem:[%s4471_s0 + $0xf0] sm:$0xff] }
 0x1a5   :  { %v1643_v57 = vmul.f32 %v3623_v4, %v1576_v25  ;;  %v1177_v48 = vsel %vm1176_vm14, %v3600_v35, %v1173_v18  ;;  %v1212_v47 = vsub.f32 1.5, %v1211_v19  ;;  %v3688_v15 = vadd.f32 1e-05, %v812_v61  ;;  %vm1216_vm4 = vmor %vm1214_vm15, %vm1215_vm1  ;;  %v448_v61 = vpop.xlane.xlu0 %447 }
 0x1a6   :  { %v1575_v59 = vmul.f32 %v1911_v52, %v1177_v48  ;;  %v1227_v30 = vsel %vm1226_vm2, %v3611_v41, %v1223_v13  ;;  %v1200_v26 = vmul.f32 %v3666_v7, %v1199_v20  ;;  %v817_v49 = vmax.f32 %v753_v43, 0.0  ;;  %v1915_v52 = vld [vmem:[%s4471_s0 + $0x110] sm:$0xff] }
 0x1a7   :  { %1707 = vst.msk [vmem:[%s4473_s2 + $0xd8] sm:$0xff] %vm75_vm0, %v1643_v57  ;;  %v1580_v35 = vmul.f32 %v1912_v3, %v1227_v30  ;;  %v1213_v14 = vmul.f32 %v3636_v38, %v1212_v47  ;;  %vm1204_vm3 = vweird.f32 %v3617_v56  ;;  %1817 = vrsqrt.f32 %v3688_v15  ;;  %v1914_v56 = vld [vmem:[%s4471_s0 + $0xe8] sm:$0xff]  ;;  %v463_v3 = vpop.xlane.xlu2 %462 }
 0x1a8   :  { %v3705_v8 = vpop.eup %1813  ;;  %v1642_v24 = vmul.f32 %v3623_v4, %v1575_v59  ;;  %v1201_v31 = vmul.f32 0.5, %v1200_v26  ;;  %v3712_v41 = vadd.f32 1e-05, %v817_v49  ;;  %v624_v5 = vmul.f32 0.03125, %v442_v9 }
 0x1a9   :  { %v3714_v28 = vpop.eup %1815  ;;  %v1647_v32 = vmul.f32 %v3623_v4, %v1580_v35  ;;  %v1217_v0 = vsel %vm1216_vm4, %v3636_v38, %v1213_v14  ;;  %vm1205_vm5 = vweird.f32 %v3666_v7  ;;  %v1249_v22 = vmul.f32 %v3705_v8, %v3653_v37  ;;  %v1916_v35 = vld [vmem:[%s4471_s0 + $0x108] sm:$0xff] }
 0x1aa   :  { %vm1254_vm6 = vweird.f32 %v3653_v37  ;;  %1706 = vst.msk [vmem:[%s4473_s2 + $0xd0] sm:$0xff] %vm75_vm0, %v1642_v24  ;;  %v1579_v33 = vmul.f32 %v1913_v11, %v1217_v0  ;;  %v1202_v44 = vsub.f32 1.5, %v1201_v31  ;;  %v1239_v46 = vmul.f32 %v3714_v28, %v3660_v54  ;;  %vm1206_vm9 = vmor %vm1204_vm3, %vm1205_vm5 }
 0x1ab   :  { %vm1244_vm7 = vweird.f32 %v3660_v54  ;;  %1711 = vst.msk [vmem:[%s4473_s2 + $0xf8] sm:$0xff] %vm75_vm0, %v1647_v32  ;;  %v1250_v38 = vmul.f32 %v3705_v8, %v1249_v22  ;;  %vm1255_vm8 = vweird.f32 %v3705_v8  ;;  %1819 = vrsqrt.f32 %v3712_v41  ;;  %v4585_v22 = vld [vmem:[#allocation25_spill] sm:$0xff] }
 0x1ac   :  { %v752_v40 = vsub.f32 %v624_v5, %v2778_v12  ;;  %v1646_v55 = vmul.f32 %v3623_v4, %v1579_v33  ;;  %v1203_v62 = vmul.f32 %v3666_v7, %v1202_v44  ;;  %v1240_v58 = vmul.f32 %v3714_v28, %v1239_v46  ;;  %vm1256_vm12 = vmor %vm1254_vm6, %vm1255_vm8  ;;  %v4586_v33 = vld [vmem:[#allocation26_spill] sm:$0xff] }
 0x1ad   :  { %v623_v51 = vmul.f32 0.03125, %v439_v42  ;;  %v3743_v27 = vpop.eup %1817  ;;  %v1251_v53 = vmul.f32 0.5, %v1250_v38  ;;  %v628_v2 = vmul.f32 0.03125, %v454_v16  ;;  %v627_v9 = vmul.f32 0.03125, %v451_v60 }
 0x1ae   :  { %v816_v17 = vmax.f32 %v752_v40, 0.0  ;;  %1710 = vst.msk [vmem:[%s4473_s2 + $0xf0] sm:$0xff] %vm75_vm0, %v1646_v55  ;;  %v1207_v12 = vsel %vm1206_vm9, %v3666_v7, %v1203_v62  ;;  %v1241_v6 = vmul.f32 0.5, %v1240_v58  ;;  %vm1245_vm10 = vweird.f32 %v3714_v28  ;;  %v460_v40 = vpop.xlane.xlu1 %459  ;;  %v457_v55 = vpop.xlane.xlu0 %456  ;;  %v4587_v58 = vld [vmem:[#allocation8_spill] sm:$0xff] }
 0x1af   :  { %v1229_v63 = vmul.f32 %v3743_v27, %v3688_v15  ;;  %v1578_v50 = vmul.f32 %v1914_v56, %v1207_v12  ;;  %v1252_v36 = vsub.f32 1.5, %v1251_v53  ;;  %v751_v39 = vsub.f32 %v623_v51, %v2764_v45  ;;  %vm1246_vm14 = vmor %vm1244_vm7, %vm1245_vm10 }
 0x1b0   :  { %v3760_v43 = vadd.f32 1e-05, %v816_v17  ;;  %v1242_v25 = vsub.f32 1.5, %v1241_v6  ;;  %v756_v18 = vsub.f32 %v628_v2, %v2782_v29  ;;  %v755_v19 = vsub.f32 %v627_v9, %v2786_v34 }
 0x1b1   :  { %v1230_v7 = vmul.f32 %v3743_v27, %v1229_v63  ;;  %v3766_v13 = vpop.eup %1819  ;;  %v1645_v20 = vmul.f32 %v3623_v4, %v1578_v50  ;;  %v1253_v42 = vmul.f32 %v3705_v8, %v1252_v36  ;;  %vm1234_vm11 = vweird.f32 %v3688_v15  ;;  %v1917_v15 = vld [vmem:[%s4471_s0 + $0x100] sm:$0xff]  ;;  %v1918_v36 = vld [vmem:[%s4471_s0 + $0x128] sm:$0xff] }
 0x1b2   :  { %1821 = vrsqrt.f32 %v3760_v43  ;;  %v1243_v45 = vmul.f32 %v3714_v28, %v1242_v25  ;;  %vm1235_vm13 = vweird.f32 %v3743_v27  ;;  %v1279_v34 = vmul.f32 %v3766_v13, %v3712_v41 }
 0x1b3   :  { %v1231_v29 = vmul.f32 0.5, %v1230_v7  ;;  %1709 = vst.msk [vmem:[%s4473_s2 + $0xe8] sm:$0xff] %vm75_vm0, %v1645_v20  ;;  %v1257_v57 = vsel %vm1256_vm12, %v3705_v8, %v1253_v42  ;;  %v815_v37 = vmax.f32 %v751_v39, 0.0  ;;  %v820_v48 = vmax.f32 %v756_v18, 0.0  ;;  %vm1236_vm15 = vmor %vm1234_vm11, %vm1235_vm13  ;;  %v4589_v7 = vld [vmem:[#allocation32_spill] sm:$0xff]  ;;  %v4590_v42 = vld [vmem:[#allocation3_spill] sm:$0xff] }
 0x1b4   :  { %v819_v47 = vmax.f32 %v755_v19, 0.0  ;;  %v1583_v59 = vmul.f32 %v1915_v52, %v1257_v57  ;;  %v1247_v30 = vsel %vm1246_vm14, %v3714_v28, %v1243_v45  ;;  %v1280_v49 = vmul.f32 %v3766_v13, %v1279_v34 }
 0x1b5   :  { %v1232_v26 = vsub.f32 1.5, %v1231_v29  ;;  %v1582_v54 = vmul.f32 %v1916_v35, %v1247_v30  ;;  %v3797_v14 = vadd.f32 1e-05, %v815_v37  ;;  %v3799_v8 = vadd.f32 1e-05, %v820_v48  ;;  %v472_v29 = vpop.xlane.xlu2 %471 }
 0x1b6   :  { %v3801_v24 = vadd.f32 1e-05, %v819_v47  ;;  %v1650_v31 = vmul.f32 %v3623_v4, %v1583_v59  ;;  %v1281_v28 = vmul.f32 0.5, %v1280_v49  ;;  %v626_v32 = vmul.f32 0.03125, %v448_v61  ;;  %v4588_v61 = vld [vmem:[#allocation11_spill] sm:$0xff] }
 0x1b7   :  { %v1233_v5 = vmul.f32 %v3743_v27, %v1232_v26  ;;  %v3808_v11 = vmul.f32 0.03125, %v4585_v22  ;;  %v3811_v44 = vmul.f32 0.03125, %v4586_v33  ;;  %v1649_v46 = vmul.f32 %v3623_v4, %v1582_v54  ;;  %v469_v22 = vpop.xlane.xlu1 %468 }
 0x1b8   :  { %v3805_v0 = vpop.eup %1821  ;;  %1823 = vrsqrt.f32 %v3797_v14  ;;  %1714 = vst.msk [vmem:[%s4473_s2 + $0x110] sm:$0xff] %vm75_vm0, %v1650_v31  ;;  %v1282_v60 = vsub.f32 1.5, %v1281_v28  ;;  %vm1285_vm1 = vweird.f32 %v3766_v13  ;;  %vm1284_vm2 = vweird.f32 %v3712_v41  ;;  %v1919_v28 = vld [vmem:[%s4471_s0 + $0x120] sm:$0xff] }
 0x1b9   :  { %v1237_v16 = vsel %vm1236_vm15, %v3743_v27, %v1233_v5  ;;  %v1269_v38 = vmul.f32 %v3805_v0, %v3760_v43  ;;  %1713 = vst.msk [vmem:[%s4473_s2 + $0x108] sm:$0xff] %vm75_vm0, %v1649_v46  ;;  %1825 = vrsqrt.f32 %v3799_v8  ;;  %v754_v51 = vsub.f32 %v626_v32, %v4587_v58  ;;  %vm1286_vm3 = vmor %vm1284_vm2, %vm1285_vm1  ;;  %v466_v46 = vpop.xlane.xlu0 %465 }
 0x1ba   :  { %v1581_v62 = vmul.f32 %v1917_v15, %v1237_v16  ;;  %v1283_v27 = vmul.f32 %v3766_v13, %v1282_v60  ;;  %1827 = vrsqrt.f32 %v3801_v24  ;;  %v631_v17 = vmul.f32 0.03125, %v463_v3 }
 0x1bb   :  { %v1270_v53 = vmul.f32 %v3805_v0, %v1269_v38  ;;  %v818_v9 = vmax.f32 %v754_v51, 0.0  ;;  %v630_v12 = vmul.f32 0.03125, %v460_v40  ;;  %v629_v6 = vmul.f32 0.03125, %v457_v55  ;;  %v4591_v55 = vld [vmem:[#allocation13_spill] sm:$0xff] }
 0x1bc   :  { %v1648_v2 = vmul.f32 %v3623_v4, %v1581_v62  ;;  %v1287_v41 = vsel %vm1286_vm3, %v3766_v13, %v1283_v27  ;;  %vm1274_vm4 = vweird.f32 %v3760_v43  ;;  %v759_v56 = vsub.f32 %v631_v17, %v4588_v61 }
 0x1bd   :  { %v1271_v63 = vmul.f32 0.5, %v1270_v53  ;;  %v1586_v39 = vmul.f32 %v1918_v36, %v1287_v41  ;;  %vm1275_vm5 = vweird.f32 %v3805_v0  ;;  %v3856_v25 = vadd.f32 1e-05, %v818_v9 }
 0x1be   :  { %v3846_v50 = vpop.eup %1823  ;;  %1712 = vst.msk [vmem:[%s4473_s2 + $0x100] sm:$0xff] %vm75_vm0, %v1648_v2  ;;  %v758_v18 = vsub.f32 %v630_v12, %v4589_v7  ;;  %v823_v20 = vmax.f32 %v759_v56, 0.0  ;;  %v757_v45 = vsub.f32 %v629_v6, %v4590_v42  ;;  %vm1264_vm6 = vweird.f32 %v3797_v14  ;;  %vm1276_vm8 = vmor %vm1274_vm4, %vm1275_vm5 }
 0x1bf   :  { %v1272_v19 = vsub.f32 1.5, %v1271_v63  ;;  %v1259_v13 = vmul.f32 %v3846_v50, %v3797_v14  ;;  %v3862_v34 = vpop.eup %1825  ;;  %v1653_v57 = vmul.f32 %v3623_v4, %v1586_v39  ;;  %1829 = vrsqrt.f32 %v3856_v25  ;;  %v1920_v14 = vld [vmem:[%s4471_s0 + $0x118] sm:$0xff] }
 0x1c0   :  { %v822_v37 = vmax.f32 %v758_v18, 0.0  ;;  %v3867_v48 = vpop.eup %1827  ;;  %v1309_v59 = vmul.f32 %v3862_v34, %v3799_v8  ;;  %vm1314_vm7 = vweird.f32 %v3799_v8  ;;  %v3884_v26 = vadd.f32 1e-05, %v823_v20  ;;  %v1921_v18 = vld [vmem:[%s4471_s0 + $0x140] sm:$0xff]  ;;  %v1922_v20 = vld [vmem:[%s4471_s0 + $0x138] sm:$0xff] }
 0x1c1   :  { %v1273_v47 = vmul.f32 %v3805_v0, %v1272_v19  ;;  %v1260_v52 = vmul.f32 %v3846_v50, %v1259_v13  ;;  %1717 = vst.msk [vmem:[%s4473_s2 + $0x128] sm:$0xff] %vm75_vm0, %v1653_v57  ;;  %v1299_v30 = vmul.f32 %v3867_v48, %v3801_v24  ;;  %v634_v3 = vmul.f32 0.03125, %v472_v29 }
 0x1c2   :  { %v3886_v49 = vadd.f32 1e-05, %v822_v37  ;;  %v1310_v31 = vmul.f32 %v3862_v34, %v1309_v59  ;;  %v821_v5 = vmax.f32 %v757_v45, 0.0  ;;  %vm1304_vm9 = vweird.f32 %v3801_v24 }
 0x1c3   :  { %v1277_v35 = vsel %vm1276_vm8, %v3805_v0, %v1273_v47  ;;  %v1261_v54 = vmul.f32 0.5, %v1260_v52  ;;  %v1300_v32 = vmul.f32 %v3867_v48, %v1299_v30  ;;  %1831 = vrsqrt.f32 %v3884_v26  ;;  %v478_v47 = vpop.xlane.xlu1 %477 }
 0x1c4   :  { %v1585_v43 = vmul.f32 %v1919_v28, %v1277_v35  ;;  %vm1265_vm10 = vweird.f32 %v3846_v50  ;;  %v1311_v0 = vmul.f32 0.5, %v1310_v31  ;;  %1833 = vrsqrt.f32 %v3886_v49  ;;  %v475_v35 = vpop.xlane.xlu0 %474  ;;  %v4592_v31 = vld [vmem:[#allocation33_spill] sm:$0xff]  ;;  %v4593_v28 = vld [vmem:[#allocation10_spill] sm:$0xff] }
 0x1c5   :  { %v1262_v33 = vsub.f32 1.5, %v1261_v54  ;;  %v3898_v16 = vpop.eup %1829  ;;  %v1301_v38 = vmul.f32 0.5, %v1300_v32  ;;  %v3901_v40 = vadd.f32 1e-05, %v821_v5  ;;  %v762_v15 = vsub.f32 %v634_v3, %v4591_v55  ;;  %vm1266_vm12 = vmor %vm1264_vm6, %vm1265_vm10 }
 0x1c6   :  { %v1652_v60 = vmul.f32 %v3623_v4, %v1585_v43  ;;  %v1312_v58 = vsub.f32 1.5, %v1311_v0  ;;  %vm1315_vm11 = vweird.f32 %v3862_v34  ;;  %v1289_v51 = vmul.f32 %v3898_v16, %v3856_v25 }
 0x1c7   :  { %v1263_v62 = vmul.f32 %v3846_v50, %v1262_v33  ;;  %v1302_v27 = vsub.f32 1.5, %v1301_v38  ;;  %vm1305_vm13 = vweird.f32 %v3867_v48  ;;  %1835 = vrsqrt.f32 %v3901_v40  ;;  %vm1316_vm15 = vmor %vm1314_vm7, %vm1315_vm11 }
 0x1c8   :  { %1716 = vst.msk [vmem:[%s4473_s2 + $0x120] sm:$0xff] %vm75_vm0, %v1652_v60  ;;  %v826_v53 = vmax.f32 %v762_v15, 0.0  ;;  %v1313_v2 = vmul.f32 %v3862_v34, %v1312_v58  ;;  %v1290_v9 = vmul.f32 %v3898_v16, %v1289_v51  ;;  %vm1294_vm14 = vweird.f32 %v3856_v25  ;;  %vm1306_vm1 = vmor %vm1304_vm9, %vm1305_vm13  ;;  %v1923_v25 = vld [vmem:[%s4471_s0 + $0x130] sm:$0xff]  ;;  %v4594_v58 = vld [vmem:[#allocation14_spill] sm:$0xff] }
 0x1c9   :  { %v1267_v17 = vsel %vm1266_vm12, %v3846_v50, %v1263_v62  ;;  %v3920_v12 = vpop.eup %1831  ;;  %v1303_v41 = vmul.f32 %v3867_v48, %v1302_v27  ;;  %v633_v61 = vmul.f32 0.03125, %v469_v22  ;;  %vm1344_vm2 = vweird.f32 %v3884_v26 }
 0x1ca   :  { %v1584_v6 = vmul.f32 %v1920_v14, %v1267_v17  ;;  %v3930_v63 = vadd.f32 1e-05, %v826_v53  ;;  %v3932_v56 = vpop.eup %1833  ;;  %v1317_v50 = vsel %vm1316_vm15, %v3862_v34, %v1313_v2  ;;  %v1291_v36 = vmul.f32 0.5, %v1290_v9  ;;  %v481_v34 = vpop.xlane.xlu2 %480 }
 0x1cb   :  { %v1339_v39 = vmul.f32 %v3920_v12, %v3884_v26  ;;  %v632_v8 = vmul.f32 0.03125, %v466_v46  ;;  %v1589_v19 = vmul.f32 %v1921_v18, %v1317_v50  ;;  %v1307_v13 = vsel %vm1306_vm1, %v3867_v48, %v1303_v41 }
 0x1cc   :  { %v1651_v7 = vmul.f32 %v3623_v4, %v1584_v6  ;;  %v1329_v24 = vmul.f32 %v3932_v56, %v3886_v49  ;;  %vm1334_vm3 = vweird.f32 %v3886_v49  ;;  %v1588_v42 = vmul.f32 %v1922_v20, %v1307_v13  ;;  %v1925_v49 = vld [vmem:[%s4471_s0 + $0x150] sm:$0xff] }
 0x1cd   :  { %v1292_v45 = vsub.f32 1.5, %v1291_v36  ;;  %vm1295_vm4 = vweird.f32 %v3898_v16  ;;  %v1340_v29 = vmul.f32 %v3920_v12, %v1339_v39  ;;  %v3955_v57 = vpop.eup %1835  ;;  %v1656_v37 = vmul.f32 %v3623_v4, %v1589_v19  ;;  %v4596_v19 = vld [vmem:[#allocation9_spill] sm:$0xff] }
 0x1ce   :  { %1715 = vst.msk [vmem:[%s4473_s2 + $0x118] sm:$0xff] %vm75_vm0, %v1651_v7  ;;  %vm1345_vm5 = vweird.f32 %v3920_v12  ;;  %v1330_v48 = vmul.f32 %v3932_v56, %v1329_v24  ;;  %1837 = vrsqrt.f32 %v3930_v63  ;;  %v1655_v52 = vmul.f32 %v3623_v4, %v1588_v42  ;;  %vm1296_vm6 = vmor %vm1294_vm14, %vm1295_vm4  ;;  %v4595_v7 = vld [vmem:[#allocation7_spill] sm:$0xff]  ;;  %v487_v24 = vpop.xlane.xlu1 %486 }
 0x1cf   :  { %v1293_v59 = vmul.f32 %v3898_v16, %v1292_v45  ;;  %v1341_v30 = vmul.f32 0.5, %v1340_v29  ;;  %v1319_v3 = vmul.f32 %v3955_v57, %v3901_v40  ;;  %1720 = vst.msk [vmem:[%s4473_s2 + $0x140] sm:$0xff] %vm75_vm0, %v1656_v37  ;;  %vm1335_vm7 = vweird.f32 %v3932_v56  ;;  %vm1346_vm8 = vmor %vm1344_vm2, %vm1345_vm5  ;;  %v1926_v37 = vld [vmem:[%s4471_s0 + $0x148] sm:$0xff] }
 0x1d0   :  { %v1331_v54 = vmul.f32 0.5, %v1330_v48  ;;  %v761_v5 = vsub.f32 %v633_v61, %v4592_v31  ;;  %v760_v43 = vsub.f32 %v632_v8, %v4593_v28  ;;  %1719 = vst.msk [vmem:[%s4473_s2 + $0x138] sm:$0xff] %vm75_vm0, %v1655_v52  ;;  %v637_v0 = vmul.f32 0.03125, %v481_v34  ;;  %vm1336_vm9 = vmor %vm1334_vm3, %vm1335_vm7  ;;  %v484_v34 = vpop.xlane.xlu0 %483 }
 0x1d1   :  { %v1297_v32 = vsel %vm1296_vm6, %v3898_v16, %v1293_v59  ;;  %v1342_v22 = vsub.f32 1.5, %v1341_v30  ;;  %v1320_v33 = vmul.f32 %v3955_v57, %v1319_v3  ;;  %v636_v27 = vmul.f32 0.03125, %v478_v47  ;;  %v4597_v59 = vld [vmem:[#allocation27_spill] sm:$0xff] }
 0x1d2   :  { %v1587_v46 = vmul.f32 %v1923_v25, %v1297_v32  ;;  %v1332_v60 = vsub.f32 1.5, %v1331_v54  ;;  %v825_v38 = vmax.f32 %v761_v5, 0.0  ;;  %v824_v55 = vmax.f32 %v760_v43, 0.0  ;;  %v490_v8 = vpop.xlane.xlu2 %489  ;;  %v4598_v25 = vld [vmem:[#allocation6_spill] sm:$0xff] }
 0x1d3   :  { %v1343_v15 = vmul.f32 %v3920_v12, %v1342_v22  ;;  %v1321_v62 = vmul.f32 0.5, %v1320_v33  ;;  %v765_v51 = vsub.f32 %v637_v0, %v4594_v58  ;;  %vm1325_vm10 = vweird.f32 %v3955_v57 }
 0x1d4   :  { %v3991_v53 = vpop.eup %1837  ;;  %v1654_v16 = vmul.f32 %v3623_v4, %v1587_v46  ;;  %v1333_v17 = vmul.f32 %v3932_v56, %v1332_v60  ;;  %v3999_v2 = vadd.f32 1e-05, %v825_v38  ;;  %v4001_v9 = vadd.f32 1e-05, %v824_v55  ;;  %v4599_v55 = vld [vmem:[#allocation36_spill] sm:$0xff] }
 0x1d5   :  { %v1347_v14 = vsel %vm1346_vm8, %v3920_v12, %v1343_v15  ;;  %v1322_v6 = vsub.f32 1.5, %v1321_v62  ;;  %v1369_v26 = vmul.f32 %v3991_v53, %v3930_v63  ;;  %v1924_v12 = vld [vmem:[%s4471_s0 + $0x158] sm:$0xff]  ;;  %vm1324_vm11 = vweird.f32 %v3901_v40  ;;  %v1927_v62 = vld [vmem:[%s4471_s0 + $0x170] sm:$0xff] }
 0x1d6   :  { %1718 = vst.msk [vmem:[%s4473_s2 + $0x130] sm:$0xff] %vm75_vm0, %v1654_v16  ;;  %v1592_v41 = vmul.f32 %v1924_v12, %v1347_v14  ;;  %v1337_v61 = vsel %vm1336_vm9, %v3932_v56, %v1333_v17  ;;  %1839 = vrsqrt.f32 %v3999_v2  ;;  %v4028_v18 = vmul.f32 0.03125, %v4595_v7  ;;  %vm1326_vm12 = vmor %vm1324_vm11, %vm1325_vm10  ;;  %v4601_v17 = vld [vmem:[#allocation34_spill] sm:$0xff] }
 0x1d7   :  { %v1591_v50 = vmul.f32 %v1925_v49, %v1337_v61  ;;  %v1323_v36 = vmul.f32 %v3955_v57, %v1322_v6  ;;  %v1370_v39 = vmul.f32 %v3991_v53, %v1369_v26  ;;  %1841 = vrsqrt.f32 %v4001_v9 }
 0x1d8   :  { %v1659_v56 = vmul.f32 %v3623_v4, %v1592_v41  ;;  %v829_v40 = vmax.f32 %v765_v51, 0.0  ;;  %v764_v13 = vsub.f32 %v636_v27, %v4596_v19  ;;  %v635_v29 = vmul.f32 0.03125, %v475_v35  ;;  %v4600_v27 = vld [vmem:[#allocation16_spill] sm:$0xff] }
 0x1d9   :  { %v1658_v20 = vmul.f32 %v3623_v4, %v1591_v50  ;;  %v1327_v42 = vsel %vm1326_vm12, %v3955_v57, %v1323_v36  ;;  %v1371_v45 = vmul.f32 0.5, %v1370_v39  ;;  %vm1375_vm13 = vweird.f32 %v3991_v53 }
 0x1da   :  { %1723 = vst.msk [vmem:[%s4473_s2 + $0x158] sm:$0xff] %vm75_vm0, %v1659_v56  ;;  %v1590_v48 = vmul.f32 %v1926_v37, %v1327_v42  ;;  %v4044_v47 = vadd.f32 1e-05, %v829_v40  ;;  %v828_v52 = vmax.f32 %v764_v13, 0.0  ;;  %v763_v30 = vsub.f32 %v635_v29, %v4597_v59  ;;  %v499_v26 = vpop.xlane.xlu2 %498  ;;  %v1928_v37 = vld [vmem:[%s4471_s0 + $0x168] sm:$0xff]  ;;  %v1929_v59 = vld [vmem:[%s4471_s0 + $0x160] sm:$0xff] }
 0x1db   :  { %1722 = vst.msk [vmem:[%s4473_s2 + $0x150] sm:$0xff] %vm75_vm0, %v1658_v20  ;;  %v1372_v57 = vsub.f32 1.5, %v1371_v45  ;;  %v640_v3 = vmul.f32 0.03125, %v490_v8  ;;  %v639_v35 = vmul.f32 0.03125, %v487_v24  ;;  %v638_v28 = vmul.f32 0.03125, %v484_v34 }
 0x1dc   :  { %v4051_v54 = vpop.eup %1839  ;;  %v1657_v31 = vmul.f32 %v3623_v4, %v1590_v48  ;;  %1843 = vrsqrt.f32 %v4044_v47  ;;  %v4055_v5 = vadd.f32 1e-05, %v828_v52  ;;  %vm1374_vm14 = vweird.f32 %v3930_v63 }
 0x1dd   :  { %v4057_v43 = vpop.eup %1841  ;;  %v1373_v32 = vmul.f32 %v3991_v53, %v1372_v57  ;;  %v1359_v22 = vmul.f32 %v4051_v54, %v3999_v2  ;;  %v827_v33 = vmax.f32 %v763_v30, 0.0  ;;  %v4065_v0 = vmul.f32 %v3808_v11, %v3808_v11  ;;  %vm1376_vm15 = vmor %vm1374_vm14, %vm1375_vm13 }
 0x1de   :  { %v4068_v46 = vmul.f32 0.03125, %v4598_v25  ;;  %1721 = vst.msk [vmem:[%s4473_s2 + $0x148] sm:$0xff] %vm75_vm0, %v1657_v31  ;;  %v1349_v63 = vmul.f32 %v4057_v43, %v4001_v9  ;;  %1845 = vrsqrt.f32 %v4055_v5  ;;  %v768_v15 = vsub.f32 %v640_v3, %v4599_v55  ;;  %v4602_v55 = vld [vmem:[#allocation28_spill] sm:$0xff] }
 0x1df   :  { %v1377_v60 = vsel %vm1376_vm15, %v3991_v53, %v1373_v32  ;;  %v1360_v11 = vmul.f32 %v4051_v54, %v1359_v22  ;;  %v4081_v38 = vadd.f32 1e-05, %v827_v33  ;;  %v767_v16 = vsub.f32 %v639_v35, %v4600_v27 }
 0x1e0   :  { %v1595_v58 = vmul.f32 %v1927_v62, %v1377_v60  ;;  %v1350_v51 = vmul.f32 %v4057_v43, %v1349_v63  ;;  %v766_v14 = vsub.f32 %v638_v28, %v4601_v17  ;;  %vm1364_vm1 = vweird.f32 %v3999_v2  ;;  %v496_v2 = vpop.xlane.xlu1 %495 }
 0x1e1   :  { %v1361_v6 = vmul.f32 0.5, %v1360_v11  ;;  %1847 = vrsqrt.f32 %v4081_v38  ;;  %v832_v53 = vmax.f32 %v768_v15, 0.0  ;;  %v831_v49 = vmax.f32 %v767_v16, 0.0  ;;  %v1930_v16 = vld [vmem:[%s4471_s0 + $0x188] sm:$0xff] }
 0x1e2   :  { %v4092_v12 = vpop.eup %1843  ;;  %v1662_v41 = vmul.f32 %v3623_v4, %v1595_v58  ;;  %v1351_v61 = vmul.f32 0.5, %v1350_v51  ;;  %v830_v50 = vmax.f32 %v766_v14, 0.0  ;;  %vm1365_vm2 = vweird.f32 %v4051_v54  ;;  %v508_v63 = vpop.xlane.xlu2 %507 }
 0x1e3   :  { %v1362_v36 = vsub.f32 1.5, %v1361_v6  ;;  %v1399_v39 = vmul.f32 %v4092_v12, %v4044_v47  ;;  %v4098_v8 = vadd.f32 1e-05, %v832_v53  ;;  %vm1354_vm3 = vweird.f32 %v4001_v9  ;;  %vm1366_vm5 = vmor %vm1364_vm1, %vm1365_vm2 }
 0x1e4   :  { %v4100_v7 = vpop.eup %1845  ;;  %1726 = vst.msk [vmem:[%s4473_s2 + $0x170] sm:$0xff] %vm75_vm0, %v1662_v41  ;;  %v1352_v56 = vsub.f32 1.5, %v1351_v61  ;;  %vm1355_vm4 = vweird.f32 %v4057_v43  ;;  %v4108_v40 = vadd.f32 1e-05, %v831_v49  ;;  %v4114_v20 = vadd.f32 1e-05, %v830_v50 }
 0x1e5   :  { %v1363_v19 = vmul.f32 %v4051_v54, %v1362_v36  ;;  %v1400_v13 = vmul.f32 %v4092_v12, %v1399_v39  ;;  %v1389_v24 = vmul.f32 %v4100_v7, %v4055_v5  ;;  %vm1404_vm6 = vweird.f32 %v4044_v47  ;;  %vm1356_vm8 = vmor %vm1354_vm3, %vm1355_vm4 }
 0x1e6   :  { %v1353_v42 = vmul.f32 %v4057_v43, %v1352_v56  ;;  %vm1394_vm7 = vweird.f32 %v4055_v5  ;;  %1849 = vrsqrt.f32 %v4098_v8  ;;  %vm1405_vm9 = vweird.f32 %v4092_v12  ;;  %v1931_v5 = vld [vmem:[%s4471_s0 + $0x180] sm:$0xff] }
 0x1e7   :  { %v4122_v9 = vpop.eup %1847  ;;  %v1367_v45 = vsel %vm1366_vm5, %v4051_v54, %v1363_v19  ;;  %v1401_v29 = vmul.f32 0.5, %v1400_v13  ;;  %v1390_v34 = vmul.f32 %v4100_v7, %v1389_v24  ;;  %1851 = vrsqrt.f32 %v4108_v40  ;;  %vm1406_vm11 = vmor %vm1404_vm6, %vm1405_vm9 }
 0x1e8   :  { %v1594_v48 = vmul.f32 %v1928_v37, %v1367_v45  ;;  %v1357_v52 = vsel %vm1356_vm8, %v4057_v43, %v1353_v42  ;;  %v1379_v57 = vmul.f32 %v4122_v9, %v4081_v38  ;;  %1853 = vrsqrt.f32 %v4114_v20  ;;  %v493_v43 = vpop.xlane.xlu0 %492  ;;  %v505_v13 = vpop.xlane.xlu1 %504 }
 0x1e9   :  { %v1593_v30 = vmul.f32 %v1929_v59, %v1357_v52  ;;  %v1402_v3 = vsub.f32 1.5, %v1401_v29  ;;  %v1391_v35 = vmul.f32 0.5, %v1390_v34  ;;  %vm1395_vm10 = vweird.f32 %v4100_v7  ;;  %v1932_v29 = vld [vmem:[%s4471_s0 + $0x178] sm:$0xff]  ;;  %v4603_v52 = vld [vmem:[#allocation35_spill] sm:$0xff] }
 0x1ea   :  { %v1661_v54 = vmul.f32 %v3623_v4, %v1594_v48  ;;  %v1380_v31 = vmul.f32 %v4122_v9, %v1379_v57  ;;  %v643_v28 = vmul.f32 0.03125, %v499_v26  ;;  %v642_v25 = vmul.f32 0.03125, %v496_v2  ;;  %vm1396_vm15 = vmor %vm1394_vm7, %vm1395_vm10 }
 0x1eb   :  { %v1660_v32 = vmul.f32 %v3623_v4, %v1593_v30  ;;  %v1403_v22 = vmul.f32 %v4092_v12, %v1402_v3  ;;  %v1392_v33 = vsub.f32 1.5, %v1391_v35  ;;  %vm1384_vm12 = vweird.f32 %v4081_v38 }
 0x1ec   :  { %v4143_v60 = vpop.eup %1849  ;;  %1725 = vst.msk [vmem:[%s4473_s2 + $0x168] sm:$0xff] %vm75_vm0, %v1661_v54  ;;  %v1381_v11 = vmul.f32 0.5, %v1380_v31  ;;  %vm1385_vm13 = vweird.f32 %v4122_v9  ;;  %v771_v15 = vsub.f32 %v643_v28, %v4602_v55  ;;  %vm1434_vm14 = vweird.f32 %v4098_v8 }
 0x1ed   :  { %v4156_v62 = vpop.eup %1851  ;;  %1724 = vst.msk [vmem:[%s4473_s2 + $0x160] sm:$0xff] %vm75_vm0, %v1660_v32  ;;  %v1407_v58 = vsel %vm1406_vm11, %v4092_v12, %v1403_v22  ;;  %v1393_v51 = vmul.f32 %v4100_v7, %v1392_v33  ;;  %v1429_v47 = vmul.f32 %v4143_v60, %v4098_v8  ;;  %v641_v27 = vmul.f32 0.03125, %v493_v43  ;;  %vm1386_vm2 = vmor %vm1384_vm12, %vm1385_vm13  ;;  %v1933_v22 = vld [vmem:[%s4471_s0 + $0x1a0] sm:$0xff] }
 0x1ee   :  { %v1598_v17 = vmul.f32 %v1930_v16, %v1407_v58  ;;  %v1382_v14 = vsub.f32 1.5, %v1381_v11  ;;  %v1419_v6 = vmul.f32 %v4156_v62, %v4108_v40  ;;  %vm1424_vm1 = vweird.f32 %v4108_v40  ;;  %v4177_v26 = vpop.eup %1853  ;;  %v1934_v40 = vld [vmem:[%s4471_s0 + $0x198] sm:$0xff]  ;;  %v517_v16 = vpop.xlane.xlu2 %516 }
 0x1ef   :  { %v646_v53 = vmul.f32 0.03125, %v508_v63  ;;  %v1397_v12 = vsel %vm1396_vm15, %v4100_v7, %v1393_v51  ;;  %v1430_v41 = vmul.f32 %v4143_v60, %v1429_v47  ;;  %v835_v61 = vmax.f32 %v771_v15, 0.0 }
 0x1f0   :  { %v770_v49 = vsub.f32 %v642_v25, %v3313_v21  ;;  %v1665_v50 = vmul.f32 %v3623_v4, %v1598_v17  ;;  %v1597_v36 = vmul.f32 %v1931_v5, %v1397_v12  ;;  %v1383_v39 = vmul.f32 %v4122_v9, %v1382_v14  ;;  %v502_v59 = vpop.xlane.xlu0 %501  ;;  %v514_v14 = vpop.xlane.xlu1 %513 }
 0x1f1   :  { %v1420_v56 = vmul.f32 %v4156_v62, %v1419_v6  ;;  %v1431_v7 = vmul.f32 0.5, %v1430_v41  ;;  %vm1435_vm3 = vweird.f32 %v4143_v60  ;;  %v1409_v21 = vmul.f32 %v4177_v26, %v4114_v20  ;;  %v4604_v41 = vld [vmem:[#allocation30_spill] sm:$0xff] }
 0x1f2   :  { %vm1414_vm4 = vweird.f32 %v4114_v20  ;;  %v4196_v19 = vadd.f32 1e-05, %v835_v61  ;;  %1729 = vst.msk [vmem:[%s4473_s2 + $0x188] sm:$0xff] %vm75_vm0, %v1665_v50  ;;  %v1664_v24 = vmul.f32 %v3623_v4, %v1597_v36  ;;  %v1387_v38 = vsel %vm1386_vm2, %v4122_v9, %v1383_v39  ;;  %vm1436_vm6 = vmor %vm1434_vm14, %vm1435_vm3 }
 0x1f3   :  { %v1421_v42 = vmul.f32 0.5, %v1420_v56  ;;  %v834_v45 = vmax.f32 %v770_v49, 0.0  ;;  %v1596_v34 = vmul.f32 %v1932_v29, %v1387_v38  ;;  %v1432_v2 = vsub.f32 1.5, %v1431_v7 }
 0x1f4   :  { %v1410_v37 = vmul.f32 %v4177_v26, %v1409_v21  ;;  %1855 = vrsqrt.f32 %v4196_v19  ;;  %1728 = vst.msk [vmem:[%s4473_s2 + $0x180] sm:$0xff] %vm75_vm0, %v1664_v24  ;;  %vm1425_vm5 = vweird.f32 %v4156_v62  ;;  %v769_v57 = vsub.f32 %v641_v27, %v4603_v52 }
 0x1f5   :  { %v1422_v48 = vsub.f32 1.5, %v1421_v42  ;;  %v4214_v9 = vadd.f32 1e-05, %v834_v45  ;;  %v1663_v30 = vmul.f32 %v3623_v4, %v1596_v34  ;;  %v1433_v3 = vmul.f32 %v4143_v60, %v1432_v2  ;;  %vm1426_vm8 = vmor %vm1424_vm1, %vm1425_vm5 }
 0x1f6   :  { %v1411_v35 = vmul.f32 0.5, %v1410_v37  ;;  %v774_v54 = vsub.f32 %v646_v53, %v3556_v23  ;;  %vm1415_vm7 = vweird.f32 %v4177_v26  ;;  %v833_v28 = vmax.f32 %v769_v57, 0.0 }
 0x1f7   :  { %v1423_v31 = vmul.f32 %v4156_v62, %v1422_v48  ;;  %1857 = vrsqrt.f32 %v4214_v9  ;;  %1727 = vst.msk [vmem:[%s4473_s2 + $0x178] sm:$0xff] %vm75_vm0, %v1663_v30  ;;  %v1437_v43 = vsel %vm1436_vm6, %v4143_v60, %v1433_v3  ;;  %v645_v32 = vmul.f32 0.03125, %v505_v13  ;;  %vm1416_vm9 = vmor %vm1414_vm4, %vm1415_vm7 }
 0x1f8   :  { %v1412_v23 = vsub.f32 1.5, %v1411_v35  ;;  %v838_v8 = vmax.f32 %v774_v54, 0.0  ;;  %v1601_v33 = vmul.f32 %v1933_v22, %v1437_v43  ;;  %v4240_v63 = vadd.f32 1e-05, %v833_v28  ;;  %v511_v56 = vpop.xlane.xlu0 %510 }
 0x1f9   :  { %v1427_v25 = vsel %vm1426_vm8, %v4156_v62, %v1423_v31  ;;  %v644_v11 = vmul.f32 0.03125, %v502_v59  ;;  %v773_v51 = vsub.f32 %v645_v32, %v3573_v1  ;;  %v713_v47 = vmul.f32 %v3811_v44, %v3811_v44  ;;  %v1936_v31 = vld [vmem:[%s4471_s0 + $0x1b8] sm:$0xff] }
 0x1fa   :  { %v4242_v55 = vpop.eup %1855  ;;  %v1600_v60 = vmul.f32 %v1934_v40, %v1427_v25  ;;  %v1413_v15 = vmul.f32 %v4177_v26, %v1412_v23  ;;  %v4248_v58 = vadd.f32 1e-05, %v838_v8  ;;  %v1668_v62 = vmul.f32 %v3623_v4, %v1601_v33  ;;  %v4336_v33 = vld [vmem:[%s4472_s1] ss:$0 sm:$0xff] }
 0x1fb   :  { %v1459_v27 = vmul.f32 %v4242_v55, %v4196_v19  ;;  %1859 = vrsqrt.f32 %v4240_v63  ;;  %v712_v17 = vmul.f32 %v4028_v18, %v4028_v18  ;;  %v4270_v20 = vmul.f32 %v4068_v46, %v4068_v46  ;;  %v1935_v18 = vld [vmem:[%s4471_s0 + $0x190] sm:$0xff] }
 0x1fc   :  { %v1667_v1 = vmul.f32 %v3623_v4, %v1600_v60  ;;  %v1417_v44 = vsel %vm1416_vm9, %v4177_v26, %v1413_v15  ;;  %1861 = vrsqrt.f32 %v4248_v58  ;;  %1732 = vst.msk [vmem:[%s4473_s2 + $0x1a0] sm:$0xff] %vm75_vm0, %v1668_v62  ;;  %v837_v12 = vmax.f32 %v773_v51, 0.0  ;;  %v523_v15 = vpop.xlane.xlu1 %522 }
 0x1fd   :  { %v4266_v6 = vpop.eup %1857  ;;  %v1599_v53 = vmul.f32 %v1935_v18, %v1417_v44  ;;  %v1460_v26 = vmul.f32 %v4242_v55, %v1459_v27  ;;  %vm1464_vm10 = vweird.f32 %v4196_v19  ;;  %v772_v61 = vsub.f32 %v644_v11, %v4604_v41 }
 0x1fe   :  { %1731 = vst.msk [vmem:[%s4473_s2 + $0x198] sm:$0xff] %vm75_vm0, %v1667_v1  ;;  %v1449_v46 = vmul.f32 %v4266_v6, %v4214_v9  ;;  %v649_v49 = vmul.f32 0.03125, %v517_v16  ;;  %v4289_v36 = vadd.f32 1e-05, %v837_v12  ;;  %v648_v39 = vmul.f32 0.03125, %v514_v14 }
 0x1ff   :  { %v1666_v50 = vmul.f32 %v3623_v4, %v1599_v53  ;;  %v1461_v5 = vmul.f32 0.5, %v1460_v26  ;;  %vm1454_vm11 = vweird.f32 %v4214_v9  ;;  %v836_v21 = vmax.f32 %v772_v61, 0.0  ;;  %v1940_v61 = vld [vmem:[%s4471_s0 + $0x1d0] sm:$0xff] }
 0x200   :  { %v1450_v7 = vmul.f32 %v4266_v6, %v1449_v46  ;;  %v777_v13 = vsub.f32 %v649_v49, %v713_v47  ;;  %vm1465_vm12 = vweird.f32 %v4242_v55  ;;  %1863 = vrsqrt.f32 %v4289_v36  ;;  %v520_v16 = vpop.xlane.xlu0 %519 }
 0x201   :  { %v4293_v24 = vpop.eup %1859  ;;  %1730 = vst.msk [vmem:[%s4473_s2 + $0x190] sm:$0xff] %vm75_vm0, %v1666_v50  ;;  %v1462_v38 = vsub.f32 1.5, %v1461_v5  ;;  %v776_v4 = vsub.f32 %v648_v39, %v712_v17  ;;  %v4305_v34 = vadd.f32 1e-05, %v836_v21  ;;  %v647_v2 = vmul.f32 0.03125, %v511_v56  ;;  %vm1466_vm14 = vmor %vm1464_vm10, %vm1465_vm12 }
 0x202   :  { %v4301_v42 = vpop.eup %1861  ;;  %v1451_v45 = vmul.f32 0.5, %v1450_v7  ;;  %v1439_v29 = vmul.f32 %v4293_v24, %v4240_v63  ;;  %vm1444_vm13 = vweird.f32 %v4240_v63  ;;  %v841_v52 = vmax.f32 %v777_v13, 0.0  ;;  %v1939_v63 = vld [vmem:[%s4471_s0 + $0x1a8] sm:$0xff] }
 0x203   :  { %v1463_v37 = vmul.f32 %v4242_v55, %v1462_v38  ;;  %v1489_v48 = vmul.f32 %v4301_v42, %v4248_v58  ;;  %vm1455_vm15 = vweird.f32 %v4266_v6  ;;  %1865 = vrsqrt.f32 %v4305_v34 }
 0x204   :  { %v1452_v57 = vsub.f32 1.5, %v1451_v45  ;;  %v1440_v59 = vmul.f32 %v4293_v24, %v1439_v29  ;;  %v4318_v35 = vadd.f32 1e-05, %v841_v52  ;;  %v840_v54 = vmax.f32 %v776_v4, 0.0  ;;  %vm1456_vm1 = vmor %vm1454_vm11, %vm1455_vm15 }
 0x205   :  { %v1467_v30 = vsel %vm1466_vm14, %v4242_v55, %v1463_v37  ;;  %v1490_v3 = vmul.f32 %v4301_v42, %v1489_v48  ;;  %v775_v23 = vsub.f32 %v647_v2, %v3546_v10  ;;  %vm1445_vm2 = vweird.f32 %v4293_v24  ;;  %v1938_v55 = vld [vmem:[%s4471_s0 + $0x1b0] sm:$0xff] }
 0x206   :  { %v1604_v19 = vmul.f32 %v1936_v31, %v1467_v30  ;;  %v1453_v28 = vmul.f32 %v4266_v6, %v1452_v57  ;;  %v1441_v43 = vmul.f32 0.5, %v1440_v59  ;;  %v4325_v8 = vpop.eup %1863  ;;  %1867 = vrsqrt.f32 %v4318_v35  ;;  %vm1446_vm5 = vmor %vm1444_vm13, %vm1445_vm2 }
 0x207   :  { %v1491_v32 = vmul.f32 0.5, %v1490_v3  ;;  %v4331_v22 = vadd.f32 1e-05, %v840_v54  ;;  %v1479_v9 = vmul.f32 %v4325_v8, %v4289_v36  ;;  %vm1495_vm3 = vweird.f32 %v4301_v42 }
 0x208   :  { %v1671_v25 = vmul.f32 %v4336_v33, %v1604_v19  ;;  %v1457_v10 = vsel %vm1456_vm1, %v4266_v6, %v1453_v28  ;;  %v1442_v11 = vsub.f32 1.5, %v1441_v43  ;;  %vm1494_vm4 = vweird.f32 %v4248_v58  ;;  %v1942_v28 = vld [vmem:[%s4471_s0 + $0x1c0] sm:$0xff] }
 0x209   :  { %v1603_v40 = vmul.f32 %v1938_v55, %v1457_v10  ;;  %v1492_v60 = vsub.f32 1.5, %v1491_v32  ;;  %1869 = vrsqrt.f32 %v4331_v22  ;;  %v4347_v51 = vpop.eup %1865  ;;  %v1480_v62 = vmul.f32 %v4325_v8, %v1479_v9  ;;  %vm1496_vm7 = vmor %vm1494_vm4, %vm1495_vm3  ;;  %v1943_v9 = vld [vmem:[%s4471_s0 + $0x1e8] sm:$0xff] }
 0x20a   :  { %1735 = vst.msk [vmem:[%s4473_s2 + $0x1b8] sm:$0xff] %vm75_vm0, %v1671_v25  ;;  %v1443_v47 = vmul.f32 %v4293_v24, %v1442_v11  ;;  %v839_v27 = vmax.f32 %v775_v23, 0.0  ;;  %vm1484_vm6 = vweird.f32 %v4289_v36  ;;  %v1469_v44 = vmul.f32 %v4347_v51, %v4305_v34  ;;  %v1941_v36 = vld [vmem:[%s4471_s0 + $0x1c8] sm:$0xff] }
 0x20b   :  { %v1670_v17 = vmul.f32 %v4336_v33, %v1603_v40  ;;  %v1493_v1 = vmul.f32 %v4301_v42, %v1492_v60  ;;  %v1481_v14 = vmul.f32 0.5, %v1480_v62  ;;  %v651_v18 = vmul.f32 0.03125, %v523_v15  ;;  %v1944_v60 = vld [vmem:[%s4471_s0 + $0x1e0] sm:$0xff] }
 0x20c   :  { %v1447_v58 = vsel %vm1446_vm5, %v4293_v24, %v1443_v47  ;;  %v4368_v6 = vadd.f32 1e-05, %v839_v27  ;;  %v1868_v53 = vpop.eup %1867  ;;  %v1470_v46 = vmul.f32 %v4347_v51, %v1469_v44  ;;  %v650_v41 = vmul.f32 0.03125, %v520_v16 }
 0x20d   :  { %1734 = vst.msk [vmem:[%s4473_s2 + $0x1b0] sm:$0xff] %vm75_vm0, %v1670_v17  ;;  %v1602_v26 = vmul.f32 %v1939_v63, %v1447_v58  ;;  %v1497_v12 = vsel %vm1496_vm7, %v4301_v42, %v1493_v1  ;;  %v1482_v50 = vsub.f32 1.5, %v1481_v14  ;;  %vm1485_vm8 = vweird.f32 %v4325_v8  ;;  %v1945_v14 = vld [vmem:[%s4471_s0 + $0x1d8] sm:$0xff] }
 0x20e   :  { %v1607_v49 = vmul.f32 %v1940_v61, %v1497_v12  ;;  %v1519_v5 = vmul.f32 %v1868_v53, %v4318_v35  ;;  %v1471_v7 = vmul.f32 0.5, %v1470_v46  ;;  %vm1474_vm9 = vweird.f32 %v4305_v34  ;;  %vm1486_vm10 = vmor %vm1484_vm6, %vm1485_vm8 }
 0x20f   :  { %v1870_v39 = vpop.eup %1869  ;;  %v1669_v56 = vmul.f32 %v4336_v33, %v1602_v26  ;;  %1871 = vrsqrt.f32 %v4368_v6  ;;  %v1483_v13 = vmul.f32 %v4325_v8, %v1482_v50  ;;  %vm1475_vm11 = vweird.f32 %v4347_v51  ;;  %v1946_v50 = vld [vmem:[%s4471_s0 + $0x1f8] sm:$0xff] }
 0x210   :  { %v1674_v21 = vmul.f32 %v4336_v33, %v1607_v49  ;;  %v1520_v24 = vmul.f32 %v1868_v53, %v1519_v5  ;;  %v1509_v38 = vmul.f32 %v1870_v39, %v4331_v22  ;;  %v1472_v4 = vsub.f32 1.5, %v1471_v7  ;;  %vm1476_vm13 = vmor %vm1474_vm9, %vm1475_vm11  ;;  %v1947_v7 = vld [vmem:[%s4471_s0 + $0x1f0] sm:$0xff] }
 0x211   :  { %1733 = vst.msk [vmem:[%s4473_s2 + $0x1a8] sm:$0xff] %vm75_vm0, %v1669_v56  ;;  %v779_v42 = vsub.f32 %v651_v18, %v4270_v20  ;;  %v778_v45 = vsub.f32 %v650_v41, %v4065_v0  ;;  %v1487_v29 = vsel %vm1486_vm10, %v4325_v8, %v1483_v13  ;;  %vm1524_vm12 = vweird.f32 %v4318_v35 }
 0x212   :  { %1738 = vst.msk [vmem:[%s4473_s2 + $0x1d0] sm:$0xff] %vm75_vm0, %v1674_v21  ;;  %v1521_v2 = vmul.f32 0.5, %v1520_v24  ;;  %v1510_v37 = vmul.f32 %v1870_v39, %v1509_v38  ;;  %v1606_v48 = vmul.f32 %v1941_v36, %v1487_v29  ;;  %v1473_v20 = vmul.f32 %v4347_v51, %v1472_v4 }
 0x213   :  { %v843_v52 = vmax.f32 %v779_v42, 0.0  ;;  %v842_v0 = vmax.f32 %v778_v45, 0.0  ;;  %vm1525_vm14 = vweird.f32 %v1868_v53  ;;  %vm1515_vm15 = vweird.f32 %v1870_v39 }
 0x214   :  { %v1522_v57 = vsub.f32 1.5, %v1521_v2  ;;  %v1511_v59 = vmul.f32 0.5, %v1510_v37  ;;  %v1673_v3 = vmul.f32 %v4336_v33, %v1606_v48  ;;  %v1477_v54 = vsel %vm1476_vm13, %v4347_v51, %v1473_v20  ;;  %vm1526_vm1 = vmor %vm1524_vm12, %vm1525_vm14 }
 0x215   :  { %v1872_v30 = vpop.eup %1871  ;;  %v907_v31 = vadd.f32 1e-05, %v843_v52  ;;  %v906_v19 = vadd.f32 1e-05, %v842_v0  ;;  %v1605_v43 = vmul.f32 %v1942_v28, %v1477_v54  ;;  %vm1514_vm2 = vweird.f32 %v4331_v22 }
 0x216   :  { %v1523_v23 = vmul.f32 %v1868_v53, %v1522_v57  ;;  %v1512_v8 = vsub.f32 1.5, %v1511_v59  ;;  %v1499_v34 = vmul.f32 %v1872_v30, %v4368_v6  ;;  %1737 = vst.msk [vmem:[%s4473_s2 + $0x1c8] sm:$0xff] %vm75_vm0, %v1673_v3  ;;  %vm1516_vm3 = vmor %vm1514_vm2, %vm1515_vm15  ;;  %vm1505_vm4 = vweird.f32 %v1872_v30 }
 0x217   :  { %1873 = vrsqrt.f32 %v907_v31  ;;  %v1672_v32 = vmul.f32 %v4336_v33, %v1605_v43  ;;  %vm1504_vm5 = vweird.f32 %v4368_v6  ;;  %vm1544_vm8 = vweird.f32 %v907_v31 }
 0x218   :  { %v1527_v25 = vsel %vm1526_vm1, %v1868_v53, %v1523_v23  ;;  %v1513_v10 = vmul.f32 %v1870_v39, %v1512_v8  ;;  %v1500_v11 = vmul.f32 %v1872_v30, %v1499_v34  ;;  %1875 = vrsqrt.f32 %v906_v19  ;;  %vm1506_vm6 = vmor %vm1504_vm5, %vm1505_vm4 }
 0x219   :  { %v1610_v55 = vmul.f32 %v1943_v9, %v1527_v25  ;;  %1736 = vst.msk [vmem:[%s4473_s2 + $0x1c0] sm:$0xff] %vm75_vm0, %v1672_v32  ;;  %vm1534_vm11 = vweird.f32 %v906_v19 }
 0x21a   :  { %v1517_v35 = vsel %vm1516_vm3, %v1870_v39, %v1513_v10  ;;  %v1501_v22 = vmul.f32 0.5, %v1500_v11 }
 0x21b   :  { %v1677_v40 = vmul.f32 %v4336_v33, %v1610_v55  ;;  %v1609_v15 = vmul.f32 %v1944_v60, %v1517_v35 }
 0x21c   :  { %v1502_v51 = vsub.f32 1.5, %v1501_v22 }
 0x21d   :  { %v1874_v47 = vpop.eup %1873  ;;  %1741 = vst.msk [vmem:[%s4473_s2 + $0x1e8] sm:$0xff] %vm75_vm0, %v1677_v40  ;;  %v1676_v62 = vmul.f32 %v4336_v33, %v1609_v15 }
 0x21e   :  { %v1503_v27 = vmul.f32 %v1872_v30, %v1502_v51  ;;  %v1539_v16 = vmul.f32 %v1874_v47, %v907_v31  ;;  %v1876_v17 = vpop.eup %1875  ;;  %vm1545_vm7 = vweird.f32 %v1874_v47 }
 0x21f   :  { %1740 = vst.msk [vmem:[%s4473_s2 + $0x1e0] sm:$0xff] %vm75_vm0, %v1676_v62  ;;  %v1529_v58 = vmul.f32 %v1876_v17, %v906_v19  ;;  %vm1535_vm9 = vweird.f32 %v1876_v17  ;;  %vm1546_vm10 = vmor %vm1544_vm8, %vm1545_vm7 }
 0x220   :  { %v1507_v1 = vsel %vm1506_vm6, %v1872_v30, %v1503_v27  ;;  %v1540_v44 = vmul.f32 %v1874_v47, %v1539_v16  ;;  %vm1536_vm12 = vmor %vm1534_vm11, %vm1535_vm9 }
 0x221   :  { %v1608_v18 = vmul.f32 %v1945_v14, %v1507_v1  ;;  %v1530_v63 = vmul.f32 %v1876_v17, %v1529_v58 }
 0x222   :  { %v1541_v53 = vmul.f32 0.5, %v1540_v44 }
 0x223   :  { %v1675_v6 = vmul.f32 %v4336_v33, %v1608_v18  ;;  %v1531_v12 = vmul.f32 0.5, %v1530_v63 }
 0x224   :  { %v1542_v26 = vsub.f32 1.5, %v1541_v53 }
 0x225   :  { %1739 = vst.msk [vmem:[%s4473_s2 + $0x1d8] sm:$0xff] %vm75_vm0, %v1675_v6  ;;  %v1532_v41 = vsub.f32 1.5, %v1531_v12 }
 0x226   :  { %v1543_v46 = vmul.f32 %v1874_v47, %v1542_v26 }
 0x227   :  { %v1533_v49 = vmul.f32 %v1876_v17, %v1532_v41 }
 0x228   :  { %v1547_v61 = vsel %vm1546_vm10, %v1874_v47, %v1543_v46 }
 0x229   :  { %v1612_v5 = vmul.f32 %v1946_v50, %v1547_v61  ;;  %v1537_v39 = vsel %vm1536_vm12, %v1876_v17, %v1533_v49 }
 0x22a   :  { %v1611_v21 = vmul.f32 %v1947_v7, %v1537_v39 }
 0x22b   :  { %v1679_v56 = vmul.f32 %v4336_v33, %v1612_v5 }
 0x22c   :  { %v1678_v13 = vmul.f32 %v4336_v33, %v1611_v21 }
 0x22d   :  { %1743 = vst.msk [vmem:[%s4473_s2 + $0x1f8] sm:$0xff] %vm75_vm0, %v1679_v56 }
 0x22e   :  { %1742 = vst.msk [vmem:[%s4473_s2 + $0x1f0] sm:$0xff] %vm75_vm0, %v1678_v13 }

</bundles_post_ra>
